<compile_context>
chip_gen: v5e
topology: v5e:2x2
jax: 0.10.0
libtpu: 0.0.40
codegen_flags: <defaults>
</compile_context>

<pallas_src>
from types import SimpleNamespace

import jax
import jax.numpy as jnp
from jax.experimental import pallas as pl
from jax.experimental.pallas import tpu as pltpu  # noqa: F401  (TPU backend)

# ----------------------------- config ---------------------------------------
B = 2            # batch
C_LAT = 4        # latent channels
H = W = 16       # latent spatial
HW = H * W       # 256 -> lane-dense last dim
SEQ_TXT = 8      # text sequence length
D = 32           # cross-attention dim == model hidden dim
CLIP_DIM = 32    # CLIP image-embedding dim
NUM_TOKENS = 4   # clip_extra_context_tokens of ImageProjModel
TIME_DIM = 32    # sinusoidal timestep-embedding dim
IP_SCALE = 1.0   # adapter scale inside IPAttnProcessor (folded into packed V_ip)
EPS = 1e-5

SEQ_ALL = SEQ_TXT + NUM_TOKENS     # 12 context tokens after the concat
SEQ_PAD = 16                       # padded to a sublane-friendly multiple of 8

# ---------------- weight-slab layout (rows x 128 lanes, f32) -----------------
R_PROJ_W = 0       # (CLIP_DIM, NUM_TOKENS*D)          rows   0: 32, cols 0:128
R_PROJ_B = 32      # (B*NUM_TOKENS, D)  pre-tiled      rows  32: 40, cols 0:32
R_LN_G = 40        # (B*NUM_TOKENS, D)  pre-tiled      rows  40: 48
R_LN_B = 48        # (B*NUM_TOKENS, D)  pre-tiled      rows  48: 56
R_W_IN_T = 56      # (D, C_LAT)   conv-in^T            rows  56: 88, cols 0:4
R_W_T_T = 88       # (D, TIME_DIM) time-proj^T         rows  88:120, cols 0:32
R_WQ_T = 120       # (D, D)  to_q^T * 1/sqrt(D)        rows 120:152
R_WKV = 152        # (D, 2D) [to_k | to_v]             rows 152:184, cols 0:64
R_WKV_IP = 184     # (D, 2D) [to_k_ip | scale*to_v_ip] rows 184:216, cols 0:64
R_WO_T = 216       # (D, D)  to_out^T                  rows 216:248
R_W_OUT_T = 248    # (C_LAT, D) conv-out^T             rows 248:252
R_COLB = 256       # (D, 8) column biases              rows 256:288, cols 0:8
SLAB_ROWS = 288    # multiple of 8
SLAB_COLS = 128


# --------------------------- Pallas kernel -----------------------------------
def _ip_adapter_fused_kernel(emb_ref, x_ref, temb_ref, txt_ref, w_ref, o_ref):
    """Fused IPAdapter forward: image_proj + cat + IP-Adapter cross-attn block.

    Big activations live in channels-first space (features on sublanes, the 256
    spatial tokens on lanes) so every load/store and VPU op is lane-dense.
    """
    f32 = jnp.float32

    # ---- ImageProjModel: ONE lane-dense (B,32)@(32,128) matmul ----------------
    proj_all = jnp.dot(emb_ref[...], w_ref[R_PROJ_W:R_PROJ_W + CLIP_DIM, :],
                       preferred_element_type=f32)                 # (B, NUM_TOKENS*D)
    # lane-packed tokens -> token rows (B*NUM_TOKENS, D), then LayerNorm per row
    ip_raw = jnp.concatenate(
        [proj_all[b:b + 1, t * D:(t + 1) * D]
         for b in range(B) for t in range(NUM_TOKENS)], axis=0)    # (B*NUM_TOKENS, D)
    ip_raw = ip_raw + w_ref[R_PROJ_B:R_PROJ_B + B * NUM_TOKENS, 0:D]
    mu = jnp.mean(ip_raw, axis=-1, keepdims=True)
    var = jnp.mean((ip_raw - mu) ** 2, axis=-1, keepdims=True)
    ipn = (ip_raw - mu) * jax.lax.rsqrt(var + EPS)
    ipn = (ipn * w_ref[R_LN_G:R_LN_G + B * NUM_TOKENS, 0:D]
           + w_ref[R_LN_B:R_LN_B + B * NUM_TOKENS, 0:D])           # ip tokens (8, D)

    # ---- timestep-embedding projection for both batch items (column space) ----
    t_cols = (jnp.dot(w_ref[R_W_T_T:R_W_T_T + D, 0:TIME_DIM], temb_ref[...],
                      preferred_element_type=f32)
              + w_ref[R_COLB:R_COLB + D, 1:2])                     # (D, B)

    # static slab views (one slab -> one DMA; slices are cheap VMEM loads)
    w_in_t = w_ref[R_W_IN_T:R_W_IN_T + D, 0:C_LAT]                 # (D, C_LAT)
    wq_t = w_ref[R_WQ_T:R_WQ_T + D, 0:D]                           # (D, D), 1/sqrt(D) folded
    wkv = w_ref[R_WKV:R_WKV + D, 0:2 * D]                          # (D, 2D)
    wkv_ip = w_ref[R_WKV_IP:R_WKV_IP + D, 0:2 * D]                 # (D, 2D)
    wo_t = w_ref[R_WO_T:R_WO_T + D, 0:D]                           # (D, D)
    w_out_t = w_ref[R_W_OUT_T:R_W_OUT_T + C_LAT, 0:D]              # (C_LAT, D)
    b_in_c = w_ref[R_COLB:R_COLB + D, 0:1]                         # (D, 1)
    b_out_c = w_ref[R_COLB:R_COLB + C_LAT, 2:3]                    # (C_LAT, 1)

    def softmax_sublane(z):
        # softmax over the key (sublane) axis; divide -> EUP reciprocal
        m = jnp.max(z, axis=0, keepdims=True)
        e = jnp.exp(z - m)
        return e * pl.reciprocal(jnp.sum(e, axis=0, keepdims=True), approx=True)

    # Batch folded into one invocation (static B=2 loop): best for v5e/v6e.
    # NOTE: on v7x a grid=(B,) with dimension_semantics=("parallel",) would use
    # both TensorCores instead; at this size launch overhead dominates either way.
    for b in range(B):
        x_b = x_ref[b]                                             # (C_LAT, HW) lane-dense
        # 1x1 conv-in + timestep-embedding add (channels-first)
        h = (jnp.dot(w_in_t, x_b, preferred_element_type=f32)
             + b_in_c + t_cols[:, b:b + 1])                        # (D, HW)
        q = jnp.dot(wq_t, h, preferred_element_type=f32)           # (D, HW), pre-scaled

        # fused K|V projections: text tokens (to_k/to_v) and ip tokens (to_k_ip/to_v_ip)
        kv_t = jnp.dot(txt_ref[b], wkv, preferred_element_type=f32)                 # (SEQ_TXT, 2D)
        kv_i = jnp.dot(ipn[b * NUM_TOKENS:(b + 1) * NUM_TOKENS, :], wkv_ip,
                       preferred_element_type=f32)                                  # (NUM_TOKENS, 2D)
        zpad = jnp.zeros((SEQ_PAD - SEQ_ALL, D), f32)
        k_pad = jnp.concatenate([kv_t[:, 0:D], kv_i[:, 0:D], zpad], axis=0)         # (16, D)
        v_pad = jnp.concatenate([kv_t[:, D:2 * D], kv_i[:, D:2 * D], zpad], axis=0)  # (16, D)

        # one matmul for both (text + ip) score blocks
        s = jnp.dot(k_pad, q, preferred_element_type=f32)                           # (16, HW)
        p = jnp.concatenate(
            [softmax_sublane(s[0:SEQ_TXT, :]),
             softmax_sublane(s[SEQ_TXT:SEQ_ALL, :]),
             jnp.zeros((SEQ_PAD - SEQ_ALL, HW), f32)], axis=0)                       # (16, HW)

        # v^T via a tile-aligned in-kernel transpose (widen to one full lane tile)
        v_wide = jnp.concatenate([v_pad, jnp.zeros((SEQ_PAD, SLAB_COLS - D), f32)],
                                 axis=1)                                             # (16, 128)
        v_t = jnp.transpose(v_wide)[0:D, :]                                          # (D, 16)
        attn = jnp.dot(v_t, p, preferred_element_type=f32)                           # (D, HW)

        # to_out residual + 1x1 conv-out; store is a lane-dense (C_LAT, 256) slab
        h = h + jnp.dot(wo_t, attn, preferred_element_type=f32)
        out = jnp.dot(w_out_t, h, preferred_element_type=f32) + b_out_c              # (C_LAT, HW)
        o_ref[b] = out.astype(o_ref.dtype)


# ------------------------------ wrappers -------------------------------------
def timestep_embedding_t(timesteps):
    """Sinusoidal timestep embedding, built directly in (TIME_DIM, B) orientation."""
    half = TIME_DIM // 2
    freqs = jnp.exp(-jnp.log(10000.0) * jnp.arange(half, dtype=jnp.float32) / half)
    args = freqs[:, None] * timesteps.astype(jnp.float32)[None, :]        # (half, B)
    # TODO(synk): diffusers' flip_sin_to_cos/downscale_freq_shift conventions not replicated.
    return jnp.concatenate([jnp.cos(args), jnp.sin(args)], axis=0)        # (TIME_DIM, B)


@jax.jit
def _forward_impl(w_slab, noisy_latents, timesteps, encoder_hidden_states, clip_embeds):
    x = noisy_latents.reshape(B, C_LAT, HW)          # pure reshape of NCHW (no transpose)
    temb_t = timestep_embedding_t(timesteps)         # (TIME_DIM, B)
    out = pl.pallas_call(
        _ip_adapter_fused_kernel,
        out_shape=jax.ShapeDtypeStruct((B, C_LAT, HW), jnp.float32),
    )(clip_embeds, x, temb_t, encoder_hidden_states, w_slab)
    return out.reshape(B, C_LAT, H, W)               # NCHW noise_pred (pure reshape)


def ip_adapter_forward(w_slab, noisy_latents, timesteps, encoder_hidden_states,
                       image_embeds):
    """Mirrors IPAdapter.forward (image_proj -> concat -> unet), fully fused."""
    clip_embeds = image_embeds["image_embeds"].image_embeds
    return _forward_impl(w_slab, noisy_latents, timesteps, encoder_hidden_states,
                         clip_embeds)


# --------------------------- parameter init / pack ---------------------------
def init_params(key):
    keys = jax.random.split(key, 12)
    s = 0.05

    def w(k, shape):
        return jax.random.normal(k, shape, jnp.float32) * s

    return {
        # ImageProjModel: Linear(CLIP_DIM -> NUM_TOKENS*D) + LayerNorm(D)
        "proj_w": w(keys[0], (CLIP_DIM, NUM_TOKENS * D)),
        "proj_b": w(keys[1], (NUM_TOKENS, D)),
        "ln_g": jnp.ones((1, D), jnp.float32),
        "ln_b": jnp.zeros((1, D), jnp.float32),
        # UNet stand-in
        "w_in": w(keys[2], (C_LAT, D)), "b_in": jnp.zeros((D,), jnp.float32),
        "w_t": w(keys[3], (TIME_DIM, D)), "b_t": jnp.zeros((D,), jnp.float32),
        "wq": w(keys[4], (D, D)),
        "wk": w(keys[5], (D, D)), "wv": w(keys[6], (D, D)),
        "wk_ip": w(keys[7], (D, D)),   # adapter_modules: to_k_ip
        "wv_ip": w(keys[8], (D, D)),   # adapter_modules: to_v_ip
        "wo": w(keys[9], (D, D)),
        "w_out": w(keys[10], (D, C_LAT)), "b_out": jnp.zeros((C_LAT,), jnp.float32),
    }


def pack_params(p):
    """Pack all weights/biases into one (SLAB_ROWS, 128) f32 slab (single DMA)."""
    slab = jnp.zeros((SLAB_ROWS, SLAB_COLS), jnp.float32)

    def put(s, r, blk):
        return s.at[r:r + blk.shape[0], 0:blk.shape[1]].set(blk)

    slab = put(slab, R_PROJ_W, p["proj_w"])                                  # (32,128)
    slab = put(slab, R_PROJ_B, jnp.tile(p["proj_b"], (B, 1)))                # (8,32)
    slab = put(slab, R_LN_G, jnp.tile(p["ln_g"], (B * NUM_TOKENS, 1)))       # (8,32)
    slab = put(slab, R_LN_B, jnp.tile(p["ln_b"], (B * NUM_TOKENS, 1)))       # (8,32)
    slab = put(slab, R_W_IN_T, p["w_in"].T)                                  # (32,4)
    slab = put(slab, R_W_T_T, p["w_t"].T)                                    # (32,32)
    slab = put(slab, R_WQ_T, p["wq"].T * (1.0 / float(D) ** 0.5))            # fold 1/sqrt(D)
    slab = put(slab, R_WKV, jnp.concatenate([p["wk"], p["wv"]], axis=1))     # (32,64)
    slab = put(slab, R_WKV_IP,
               jnp.concatenate([p["wk_ip"], IP_SCALE * p["wv_ip"]], axis=1))  # fold ip scale
    slab = put(slab, R_WO_T, p["wo"].T)                                      # (32,32)
    slab = put(slab, R_W_OUT_T, p["w_out"].T)                                # (4,32)
    colb = jnp.zeros((D, 8), jnp.float32)
    colb = colb.at[:, 0].set(p["b_in"])
    colb = colb.at[:, 1].set(p["b_t"])
    colb = colb.at[:C_LAT, 2].set(p["b_out"])
    slab = put(slab, R_COLB, colb)                                           # (32,8)
    return slab


# ------------------------------- main -----------------------------------------
if __name__ == "__main__":
    key = jax.random.PRNGKey(0)
    k1, k2, k3, kp = jax.random.split(key, 4)

    noisy_latents = jax.random.normal(k1, (B, C_LAT, H, W), jnp.float32)   # NCHW
    timesteps = jnp.array([10, 500], dtype=jnp.int32)
    encoder_hidden_states = jax.random.normal(k2, (B, SEQ_TXT, D), jnp.float32)
    clip_image_embeds = jax.random.normal(k3, (B, CLIP_DIM), jnp.float32)

    # mimic the image_embeds['image_embeds'].image_embeds access in forward()
    image_embeds = {"image_embeds": SimpleNamespace(image_embeds=clip_image_embeds)}

    w_slab = pack_params(init_params(kp))

    noise_pred = ip_adapter_forward(w_slab, noisy_latents, timesteps,
                                    encoder_hidden_states, image_embeds)
    noise_pred = jax.block_until_ready(noise_pred)
    assert noise_pred.shape == (B, C_LAT, H, W)
    assert bool(jnp.all(jnp.isfinite(noise_pred)))
    print("KERNEL_OK")
</pallas_src>

<mosaic_0001>
module attributes {stable_mosaic.version = 11 : i64} {
  func.func @_ip_adapter_fused_kernel(%arg0: memref<2x32xf32, #tpu.memory_space<vmem>>, %arg1: memref<2x4x256xf32, #tpu.memory_space<vmem>>, %arg2: memref<32x2xf32, #tpu.memory_space<vmem>>, %arg3: memref<2x8x32xf32, #tpu.memory_space<vmem>>, %arg4: memref<288x128xf32, #tpu.memory_space<vmem>>, %arg5: memref<2x4x256xf32, #tpu.memory_space<vmem>>) attributes {dimension_semantics = [], scalar_prefetch = 0 : i64, scratch_operands = 0 : i64, tpu.core_type = #tpu.core_type<tc>} {
    %c0 = arith.constant 0 : index
    %c0_0 = arith.constant 0 : index
    %0 = vector.load %arg0[%c0, %c0_0] : memref<2x32xf32, #tpu.memory_space<vmem>>, vector<2x32xf32>
    %c0_1 = arith.constant 0 : index
    %c0_2 = arith.constant 0 : index
    %1 = vector.load %arg4[%c0_1, %c0_2] : memref<288x128xf32, #tpu.memory_space<vmem>>, vector<32x128xf32>
    %cst = arith.constant dense<0.000000e+00> : vector<2x128xf32>
    %2 = tpu.matmul %0, %1, %cst {dimension_numbers = #tpu.dot_dimension_numbers<[1], [0], [0], [1], [0, 0, 1, 1], [], []>} : vector<2x32xf32>, vector<32x128xf32>, vector<2x128xf32> -> vector<2x128xf32>
    %3 = vector.extract_strided_slice %2 {offsets = [0, 0], sizes = [1, 32], strides = [1, 1]} : vector<2x128xf32> to vector<1x32xf32>
    %4 = vector.extract_strided_slice %2 {offsets = [0, 32], sizes = [1, 32], strides = [1, 1]} : vector<2x128xf32> to vector<1x32xf32>
    %5 = vector.extract_strided_slice %2 {offsets = [0, 64], sizes = [1, 32], strides = [1, 1]} : vector<2x128xf32> to vector<1x32xf32>
    %6 = vector.extract_strided_slice %2 {offsets = [0, 96], sizes = [1, 32], strides = [1, 1]} : vector<2x128xf32> to vector<1x32xf32>
    %7 = vector.extract_strided_slice %2 {offsets = [1, 0], sizes = [1, 32], strides = [1, 1]} : vector<2x128xf32> to vector<1x32xf32>
    %8 = vector.extract_strided_slice %2 {offsets = [1, 32], sizes = [1, 32], strides = [1, 1]} : vector<2x128xf32> to vector<1x32xf32>
    %9 = vector.extract_strided_slice %2 {offsets = [1, 64], sizes = [1, 32], strides = [1, 1]} : vector<2x128xf32> to vector<1x32xf32>
    %10 = vector.extract_strided_slice %2 {offsets = [1, 96], sizes = [1, 32], strides = [1, 1]} : vector<2x128xf32> to vector<1x32xf32>
    %11 = tpu.concatenate %3, %4, %5, %6, %7, %8, %9, %10 in 0 : vector<1x32xf32>, vector<1x32xf32>, vector<1x32xf32>, vector<1x32xf32>, vector<1x32xf32>, vector<1x32xf32>, vector<1x32xf32>, vector<1x32xf32> -> vector<8x32xf32>
    %c32 = arith.constant 32 : index
    %c0_3 = arith.constant 0 : index
    %12 = vector.load %arg4[%c32, %c0_3] : memref<288x128xf32, #tpu.memory_space<vmem>>, vector<8x32xf32>
    %13 = arith.addf %11, %12 : vector<8x32xf32>
    %cst_4 = arith.constant dense<0.000000e+00> : vector<8xf32>
    %14 = vector.multi_reduction <add>, %13, %cst_4 [1] : vector<8x32xf32> to vector<8xf32>
    %15 = vector.shape_cast %14 : vector<8xf32> to vector<8x1xf32>
    %cst_5 = arith.constant 3.200000e+01 : f32
    %16 = vector.broadcast %cst_5 : f32 to vector<8x1xf32>
    %17 = arith.divf %15, %16 : vector<8x1xf32>
    %18 = vector.broadcast %17 : vector<8x1xf32> to vector<8x32xf32>
    %19 = arith.subf %13, %18 : vector<8x32xf32>
    %20 = arith.mulf %19, %19 : vector<8x32xf32>
    %cst_6 = arith.constant dense<0.000000e+00> : vector<8xf32>
    %21 = vector.multi_reduction <add>, %20, %cst_6 [1] : vector<8x32xf32> to vector<8xf32>
    %22 = vector.shape_cast %21 : vector<8xf32> to vector<8x1xf32>
    %cst_7 = arith.constant 3.200000e+01 : f32
    %23 = vector.broadcast %cst_7 : f32 to vector<8x1xf32>
    %24 = arith.divf %22, %23 : vector<8x1xf32>
    %25 = vector.broadcast %17 : vector<8x1xf32> to vector<8x32xf32>
    %26 = arith.subf %13, %25 : vector<8x32xf32>
    %cst_8 = arith.constant 9.99999974E-6 : f32
    %27 = vector.broadcast %cst_8 : f32 to vector<8x1xf32>
    %28 = arith.addf %24, %27 : vector<8x1xf32>
    %29 = math.rsqrt %28 : vector<8x1xf32>
    %30 = vector.broadcast %29 : vector<8x1xf32> to vector<8x32xf32>
    %31 = arith.mulf %26, %30 : vector<8x32xf32>
    %c40 = arith.constant 40 : index
    %c0_9 = arith.constant 0 : index
    %32 = vector.load %arg4[%c40, %c0_9] : memref<288x128xf32, #tpu.memory_space<vmem>>, vector<8x32xf32>
    %33 = arith.mulf %31, %32 : vector<8x32xf32>
    %c48 = arith.constant 48 : index
    %c0_10 = arith.constant 0 : index
    %34 = vector.load %arg4[%c48, %c0_10] : memref<288x128xf32, #tpu.memory_space<vmem>>, vector<8x32xf32>
    %35 = arith.addf %33, %34 : vector<8x32xf32>
    %c88 = arith.constant 88 : index
    %c0_11 = arith.constant 0 : index
    %36 = vector.load %arg4[%c88, %c0_11] : memref<288x128xf32, #tpu.memory_space<vmem>>, vector<32x32xf32>
    %c0_12 = arith.constant 0 : index
    %c0_13 = arith.constant 0 : index
    %37 = vector.load %arg2[%c0_12, %c0_13] : memref<32x2xf32, #tpu.memory_space<vmem>>, vector<32x2xf32>
    %cst_14 = arith.constant dense<0.000000e+00> : vector<32x2xf32>
    %38 = tpu.matmul %36, %37, %cst_14 {dimension_numbers = #tpu.dot_dimension_numbers<[1], [0], [0], [1], [0, 0, 1, 1], [], []>} : vector<32x32xf32>, vector<32x2xf32>, vector<32x2xf32> -> vector<32x2xf32>
    %c256 = arith.constant 256 : index
    %c1 = arith.constant 1 : index
    %39 = vector.load %arg4[%c256, %c1] : memref<288x128xf32, #tpu.memory_space<vmem>>, vector<32x1xf32>
    %40 = vector.broadcast %39 : vector<32x1xf32> to vector<32x2xf32>
    %41 = arith.addf %38, %40 : vector<32x2xf32>
    %c56 = arith.constant 56 : index
    %c0_15 = arith.constant 0 : index
    %42 = vector.load %arg4[%c56, %c0_15] : memref<288x128xf32, #tpu.memory_space<vmem>>, vector<32x4xf32>
    %c120 = arith.constant 120 : index
    %c0_16 = arith.constant 0 : index
    %43 = vector.load %arg4[%c120, %c0_16] : memref<288x128xf32, #tpu.memory_space<vmem>>, vector<32x32xf32>
    %c152 = arith.constant 152 : index
    %c0_17 = arith.constant 0 : index
    %44 = vector.load %arg4[%c152, %c0_17] : memref<288x128xf32, #tpu.memory_space<vmem>>, vector<32x64xf32>
    %c184 = arith.constant 184 : index
    %c0_18 = arith.constant 0 : index
    %45 = vector.load %arg4[%c184, %c0_18] : memref<288x128xf32, #tpu.memory_space<vmem>>, vector<32x64xf32>
    %c216 = arith.constant 216 : index
    %c0_19 = arith.constant 0 : index
    %46 = vector.load %arg4[%c216, %c0_19] : memref<288x128xf32, #tpu.memory_space<vmem>>, vector<32x32xf32>
    %c248 = arith.constant 248 : index
    %c0_20 = arith.constant 0 : index
    %47 = vector.load %arg4[%c248, %c0_20] : memref<288x128xf32, #tpu.memory_space<vmem>>, vector<4x32xf32>
    %c256_21 = arith.constant 256 : index
    %c0_22 = arith.constant 0 : index
    %48 = vector.load %arg4[%c256_21, %c0_22] : memref<288x128xf32, #tpu.memory_space<vmem>>, vector<32x1xf32>
    %c256_23 = arith.constant 256 : index
    %c2 = arith.constant 2 : index
    %49 = vector.load %arg4[%c256_23, %c2] : memref<288x128xf32, #tpu.memory_space<vmem>>, vector<4x1xf32>
    %c0_24 = arith.constant 0 : index
    %c0_25 = arith.constant 0 : index
    %c0_26 = arith.constant 0 : index
    %50 = vector.load %arg1[%c0_24, %c0_25, %c0_26] : memref<2x4x256xf32, #tpu.memory_space<vmem>>, vector<1x4x256xf32>
    %51 = vector.shape_cast %50 : vector<1x4x256xf32> to vector<4x256xf32>
    %cst_27 = arith.constant dense<0.000000e+00> : vector<32x256xf32>
    %52 = tpu.matmul %42, %51, %cst_27 {dimension_numbers = #tpu.dot_dimension_numbers<[1], [0], [0], [1], [0, 0, 1, 1], [], []>} : vector<32x4xf32>, vector<4x256xf32>, vector<32x256xf32> -> vector<32x256xf32>
    %53 = vector.broadcast %48 : vector<32x1xf32> to vector<32x256xf32>
    %54 = arith.addf %52, %53 : vector<32x256xf32>
    %55 = vector.extract_strided_slice %41 {offsets = [0, 0], sizes = [32, 1], strides = [1, 1]} : vector<32x2xf32> to vector<32x1xf32>
    %56 = vector.broadcast %55 : vector<32x1xf32> to vector<32x256xf32>
    %57 = arith.addf %54, %56 : vector<32x256xf32>
    %cst_28 = arith.constant dense<0.000000e+00> : vector<32x256xf32>
    %58 = tpu.matmul %43, %57, %cst_28 {dimension_numbers = #tpu.dot_dimension_numbers<[1], [0], [0], [1], [0, 0, 1, 1], [], []>} : vector<32x32xf32>, vector<32x256xf32>, vector<32x256xf32> -> vector<32x256xf32>
    %c0_29 = arith.constant 0 : index
    %c0_30 = arith.constant 0 : index
    %c0_31 = arith.constant 0 : index
    %59 = vector.load %arg3[%c0_29, %c0_30, %c0_31] : memref<2x8x32xf32, #tpu.memory_space<vmem>>, vector<1x8x32xf32>
    %60 = vector.shape_cast %59 : vector<1x8x32xf32> to vector<8x32xf32>
    %cst_32 = arith.constant dense<0.000000e+00> : vector<8x64xf32>
    %61 = tpu.matmul %60, %44, %cst_32 {dimension_numbers = #tpu.dot_dimension_numbers<[1], [0], [0], [1], [0, 0, 1, 1], [], []>} : vector<8x32xf32>, vector<32x64xf32>, vector<8x64xf32> -> vector<8x64xf32>
    %62 = vector.extract_strided_slice %35 {offsets = [0, 0], sizes = [4, 32], strides = [1, 1]} : vector<8x32xf32> to vector<4x32xf32>
    %cst_33 = arith.constant dense<0.000000e+00> : vector<4x64xf32>
    %63 = tpu.matmul %62, %45, %cst_33 {dimension_numbers = #tpu.dot_dimension_numbers<[1], [0], [0], [1], [0, 0, 1, 1], [], []>} : vector<4x32xf32>, vector<32x64xf32>, vector<4x64xf32> -> vector<4x64xf32>
    %cst_34 = arith.constant 0.000000e+00 : f32
    %64 = vector.broadcast %cst_34 : f32 to vector<4x32xf32>
    %65 = vector.extract_strided_slice %61 {offsets = [0, 0], sizes = [8, 32], strides = [1, 1]} : vector<8x64xf32> to vector<8x32xf32>
    %66 = vector.extract_strided_slice %63 {offsets = [0, 0], sizes = [4, 32], strides = [1, 1]} : vector<4x64xf32> to vector<4x32xf32>
    %67 = tpu.concatenate %65, %66, %64 in 0 : vector<8x32xf32>, vector<4x32xf32>, vector<4x32xf32> -> vector<16x32xf32>
    %68 = vector.extract_strided_slice %61 {offsets = [0, 32], sizes = [8, 32], strides = [1, 1]} : vector<8x64xf32> to vector<8x32xf32>
    %69 = vector.extract_strided_slice %63 {offsets = [0, 32], sizes = [4, 32], strides = [1, 1]} : vector<4x64xf32> to vector<4x32xf32>
    %70 = tpu.concatenate %68, %69, %64 in 0 : vector<8x32xf32>, vector<4x32xf32>, vector<4x32xf32> -> vector<16x32xf32>
    %cst_35 = arith.constant dense<0.000000e+00> : vector<16x256xf32>
    %71 = tpu.matmul %67, %58, %cst_35 {dimension_numbers = #tpu.dot_dimension_numbers<[1], [0], [0], [1], [0, 0, 1, 1], [], []>} : vector<16x32xf32>, vector<32x256xf32>, vector<16x256xf32> -> vector<16x256xf32>
    %72 = vector.extract_strided_slice %71 {offsets = [0, 0], sizes = [8, 256], strides = [1, 1]} : vector<16x256xf32> to vector<8x256xf32>
    %cst_36 = arith.constant dense<0xFF800000> : vector<256xf32>
    %73 = vector.multi_reduction <maximumf>, %72, %cst_36 [0] : vector<8x256xf32> to vector<256xf32>
    %74 = vector.shape_cast %73 : vector<256xf32> to vector<1x256xf32>
    %75 = vector.broadcast %74 : vector<1x256xf32> to vector<8x256xf32>
    %76 = arith.subf %72, %75 : vector<8x256xf32>
    %77 = math.exp %76 : vector<8x256xf32>
    %cst_37 = arith.constant dense<0.000000e+00> : vector<256xf32>
    %78 = vector.multi_reduction <add>, %77, %cst_37 [0] : vector<8x256xf32> to vector<256xf32>
    %79 = vector.shape_cast %78 : vector<256xf32> to vector<1x256xf32>
    %80 = tpu.reciprocal %79 {approx = true} : vector<1x256xf32> -> vector<1x256xf32>
    %81 = vector.broadcast %80 : vector<1x256xf32> to vector<8x256xf32>
    %82 = arith.mulf %77, %81 : vector<8x256xf32>
    %83 = vector.extract_strided_slice %71 {offsets = [8, 0], sizes = [4, 256], strides = [1, 1]} : vector<16x256xf32> to vector<4x256xf32>
    %cst_38 = arith.constant dense<0xFF800000> : vector<256xf32>
    %84 = vector.multi_reduction <maximumf>, %83, %cst_38 [0] : vector<4x256xf32> to vector<256xf32>
    %85 = vector.shape_cast %84 : vector<256xf32> to vector<1x256xf32>
    %86 = vector.broadcast %85 : vector<1x256xf32> to vector<4x256xf32>
    %87 = arith.subf %83, %86 : vector<4x256xf32>
    %88 = math.exp %87 : vector<4x256xf32>
    %cst_39 = arith.constant dense<0.000000e+00> : vector<256xf32>
    %89 = vector.multi_reduction <add>, %88, %cst_39 [0] : vector<4x256xf32> to vector<256xf32>
    %90 = vector.shape_cast %89 : vector<256xf32> to vector<1x256xf32>
    %91 = tpu.reciprocal %90 {approx = true} : vector<1x256xf32> -> vector<1x256xf32>
    %92 = vector.broadcast %91 : vector<1x256xf32> to vector<4x256xf32>
    %93 = arith.mulf %88, %92 : vector<4x256xf32>
    %cst_40 = arith.constant 0.000000e+00 : f32
    %94 = vector.broadcast %cst_40 : f32 to vector<4x256xf32>
    %95 = tpu.concatenate %82, %93, %94 in 0 : vector<8x256xf32>, vector<4x256xf32>, vector<4x256xf32> -> vector<16x256xf32>
    %cst_41 = arith.constant 0.000000e+00 : f32
    %96 = vector.broadcast %cst_41 : f32 to vector<16x96xf32>
    %97 = tpu.concatenate %70, %96 in 1 : vector<16x32xf32>, vector<16x96xf32> -> vector<16x128xf32>
    %98 = tpu.transpose %97, [1, 0] : vector<16x128xf32> -> vector<128x16xf32>
    %99 = vector.extract_strided_slice %98 {offsets = [0, 0], sizes = [32, 16], strides = [1, 1]} : vector<128x16xf32> to vector<32x16xf32>
    %cst_42 = arith.constant dense<0.000000e+00> : vector<32x256xf32>
    %100 = tpu.matmul %99, %95, %cst_42 {dimension_numbers = #tpu.dot_dimension_numbers<[1], [0], [0], [1], [0, 0, 1, 1], [], []>} : vector<32x16xf32>, vector<16x256xf32>, vector<32x256xf32> -> vector<32x256xf32>
    %cst_43 = arith.constant dense<0.000000e+00> : vector<32x256xf32>
    %101 = tpu.matmul %46, %100, %cst_43 {dimension_numbers = #tpu.dot_dimension_numbers<[1], [0], [0], [1], [0, 0, 1, 1], [], []>} : vector<32x32xf32>, vector<32x256xf32>, vector<32x256xf32> -> vector<32x256xf32>
    %102 = arith.addf %57, %101 : vector<32x256xf32>
    %cst_44 = arith.constant dense<0.000000e+00> : vector<4x256xf32>
    %103 = tpu.matmul %47, %102, %cst_44 {dimension_numbers = #tpu.dot_dimension_numbers<[1], [0], [0], [1], [0, 0, 1, 1], [], []>} : vector<4x32xf32>, vector<32x256xf32>, vector<4x256xf32> -> vector<4x256xf32>
    %104 = vector.broadcast %49 : vector<4x1xf32> to vector<4x256xf32>
    %105 = arith.addf %103, %104 : vector<4x256xf32>
    %c0_45 = arith.constant 0 : index
    %c0_46 = arith.constant 0 : index
    %c0_47 = arith.constant 0 : index
    %106 = vector.load %arg5[%c0_45, %c0_46, %c0_47] : memref<2x4x256xf32, #tpu.memory_space<vmem>>, vector<1x4x256xf32>
    %107 = vector.shape_cast %106 : vector<1x4x256xf32> to vector<4x256xf32>
    %108 = vector.shape_cast %105 : vector<4x256xf32> to vector<1x4x256xf32>
    tpu.vector_store %arg5[%c0_45, %c0_46, %c0_47], %108 {strides = array<i32>} : memref<2x4x256xf32, #tpu.memory_space<vmem>>, vector<1x4x256xf32>,
    %c1_48 = arith.constant 1 : index
    %c0_49 = arith.constant 0 : index
    %c0_50 = arith.constant 0 : index
    %109 = vector.load %arg1[%c1_48, %c0_49, %c0_50] : memref<2x4x256xf32, #tpu.memory_space<vmem>>, vector<1x4x256xf32>
    %110 = vector.shape_cast %109 : vector<1x4x256xf32> to vector<4x256xf32>
    %cst_51 = arith.constant dense<0.000000e+00> : vector<32x256xf32>
    %111 = tpu.matmul %42, %110, %cst_51 {dimension_numbers = #tpu.dot_dimension_numbers<[1], [0], [0], [1], [0, 0, 1, 1], [], []>} : vector<32x4xf32>, vector<4x256xf32>, vector<32x256xf32> -> vector<32x256xf32>
    %112 = vector.broadcast %48 : vector<32x1xf32> to vector<32x256xf32>
    %113 = arith.addf %111, %112 : vector<32x256xf32>
    %114 = vector.extract_strided_slice %41 {offsets = [0, 1], sizes = [32, 1], strides = [1, 1]} : vector<32x2xf32> to vector<32x1xf32>
    %115 = vector.broadcast %114 : vector<32x1xf32> to vector<32x256xf32>
    %116 = arith.addf %113, %115 : vector<32x256xf32>
    %cst_52 = arith.constant dense<0.000000e+00> : vector<32x256xf32>
    %117 = tpu.matmul %43, %116, %cst_52 {dimension_numbers = #tpu.dot_dimension_numbers<[1], [0], [0], [1], [0, 0, 1, 1], [], []>} : vector<32x32xf32>, vector<32x256xf32>, vector<32x256xf32> -> vector<32x256xf32>
    %c1_53 = arith.constant 1 : index
    %c0_54 = arith.constant 0 : index
    %c0_55 = arith.constant 0 : index
    %118 = vector.load %arg3[%c1_53, %c0_54, %c0_55] : memref<2x8x32xf32, #tpu.memory_space<vmem>>, vector<1x8x32xf32>
    %119 = vector.shape_cast %118 : vector<1x8x32xf32> to vector<8x32xf32>
    %cst_56 = arith.constant dense<0.000000e+00> : vector<8x64xf32>
    %120 = tpu.matmul %119, %44, %cst_56 {dimension_numbers = #tpu.dot_dimension_numbers<[1], [0], [0], [1], [0, 0, 1, 1], [], []>} : vector<8x32xf32>, vector<32x64xf32>, vector<8x64xf32> -> vector<8x64xf32>
    %121 = vector.extract_strided_slice %35 {offsets = [4, 0], sizes = [4, 32], strides = [1, 1]} : vector<8x32xf32> to vector<4x32xf32>
    %cst_57 = arith.constant dense<0.000000e+00> : vector<4x64xf32>
    %122 = tpu.matmul %121, %45, %cst_57 {dimension_numbers = #tpu.dot_dimension_numbers<[1], [0], [0], [1], [0, 0, 1, 1], [], []>} : vector<4x32xf32>, vector<32x64xf32>, vector<4x64xf32> -> vector<4x64xf32>
    %cst_58 = arith.constant 0.000000e+00 : f32
    %123 = vector.broadcast %cst_58 : f32 to vector<4x32xf32>
    %124 = vector.extract_strided_slice %120 {offsets = [0, 0], sizes = [8, 32], strides = [1, 1]} : vector<8x64xf32> to vector<8x32xf32>
    %125 = vector.extract_strided_slice %122 {offsets = [0, 0], sizes = [4, 32], strides = [1, 1]} : vector<4x64xf32> to vector<4x32xf32>
    %126 = tpu.concatenate %124, %125, %123 in 0 : vector<8x32xf32>, vector<4x32xf32>, vector<4x32xf32> -> vector<16x32xf32>
    %127 = vector.extract_strided_slice %120 {offsets = [0, 32], sizes = [8, 32], strides = [1, 1]} : vector<8x64xf32> to vector<8x32xf32>
    %128 = vector.extract_strided_slice %122 {offsets = [0, 32], sizes = [4, 32], strides = [1, 1]} : vector<4x64xf32> to vector<4x32xf32>
    %129 = tpu.concatenate %127, %128, %123 in 0 : vector<8x32xf32>, vector<4x32xf32>, vector<4x32xf32> -> vector<16x32xf32>
    %cst_59 = arith.constant dense<0.000000e+00> : vector<16x256xf32>
    %130 = tpu.matmul %126, %117, %cst_59 {dimension_numbers = #tpu.dot_dimension_numbers<[1], [0], [0], [1], [0, 0, 1, 1], [], []>} : vector<16x32xf32>, vector<32x256xf32>, vector<16x256xf32> -> vector<16x256xf32>
    %131 = vector.extract_strided_slice %130 {offsets = [0, 0], sizes = [8, 256], strides = [1, 1]} : vector<16x256xf32> to vector<8x256xf32>
    %cst_60 = arith.constant dense<0xFF800000> : vector<256xf32>
    %132 = vector.multi_reduction <maximumf>, %131, %cst_60 [0] : vector<8x256xf32> to vector<256xf32>
    %133 = vector.shape_cast %132 : vector<256xf32> to vector<1x256xf32>
    %134 = vector.broadcast %133 : vector<1x256xf32> to vector<8x256xf32>
    %135 = arith.subf %131, %134 : vector<8x256xf32>
    %136 = math.exp %135 : vector<8x256xf32>
    %cst_61 = arith.constant dense<0.000000e+00> : vector<256xf32>
    %137 = vector.multi_reduction <add>, %136, %cst_61 [0] : vector<8x256xf32> to vector<256xf32>
    %138 = vector.shape_cast %137 : vector<256xf32> to vector<1x256xf32>
    %139 = tpu.reciprocal %138 {approx = true} : vector<1x256xf32> -> vector<1x256xf32>
    %140 = vector.broadcast %139 : vector<1x256xf32> to vector<8x256xf32>
    %141 = arith.mulf %136, %140 : vector<8x256xf32>
    %142 = vector.extract_strided_slice %130 {offsets = [8, 0], sizes = [4, 256], strides = [1, 1]} : vector<16x256xf32> to vector<4x256xf32>
    %cst_62 = arith.constant dense<0xFF800000> : vector<256xf32>
    %143 = vector.multi_reduction <maximumf>, %142, %cst_62 [0] : vector<4x256xf32> to vector<256xf32>
    %144 = vector.shape_cast %143 : vector<256xf32> to vector<1x256xf32>
    %145 = vector.broadcast %144 : vector<1x256xf32> to vector<4x256xf32>
    %146 = arith.subf %142, %145 : vector<4x256xf32>
    %147 = math.exp %146 : vector<4x256xf32>
    %cst_63 = arith.constant dense<0.000000e+00> : vector<256xf32>
    %148 = vector.multi_reduction <add>, %147, %cst_63 [0] : vector<4x256xf32> to vector<256xf32>
    %149 = vector.shape_cast %148 : vector<256xf32> to vector<1x256xf32>
    %150 = tpu.reciprocal %149 {approx = true} : vector<1x256xf32> -> vector<1x256xf32>
    %151 = vector.broadcast %150 : vector<1x256xf32> to vector<4x256xf32>
    %152 = arith.mulf %147, %151 : vector<4x256xf32>
    %cst_64 = arith.constant 0.000000e+00 : f32
    %153 = vector.broadcast %cst_64 : f32 to vector<4x256xf32>
    %154 = tpu.concatenate %141, %152, %153 in 0 : vector<8x256xf32>, vector<4x256xf32>, vector<4x256xf32> -> vector<16x256xf32>
    %cst_65 = arith.constant 0.000000e+00 : f32
    %155 = vector.broadcast %cst_65 : f32 to vector<16x96xf32>
    %156 = tpu.concatenate %129, %155 in 1 : vector<16x32xf32>, vector<16x96xf32> -> vector<16x128xf32>
    %157 = tpu.transpose %156, [1, 0] : vector<16x128xf32> -> vector<128x16xf32>
    %158 = vector.extract_strided_slice %157 {offsets = [0, 0], sizes = [32, 16], strides = [1, 1]} : vector<128x16xf32> to vector<32x16xf32>
    %cst_66 = arith.constant dense<0.000000e+00> : vector<32x256xf32>
    %159 = tpu.matmul %158, %154, %cst_66 {dimension_numbers = #tpu.dot_dimension_numbers<[1], [0], [0], [1], [0, 0, 1, 1], [], []>} : vector<32x16xf32>, vector<16x256xf32>, vector<32x256xf32> -> vector<32x256xf32>
    %cst_67 = arith.constant dense<0.000000e+00> : vector<32x256xf32>
    %160 = tpu.matmul %46, %159, %cst_67 {dimension_numbers = #tpu.dot_dimension_numbers<[1], [0], [0], [1], [0, 0, 1, 1], [], []>} : vector<32x32xf32>, vector<32x256xf32>, vector<32x256xf32> -> vector<32x256xf32>
    %161 = arith.addf %116, %160 : vector<32x256xf32>
    %cst_68 = arith.constant dense<0.000000e+00> : vector<4x256xf32>
    %162 = tpu.matmul %47, %161, %cst_68 {dimension_numbers = #tpu.dot_dimension_numbers<[1], [0], [0], [1], [0, 0, 1, 1], [], []>} : vector<4x32xf32>, vector<32x256xf32>, vector<4x256xf32> -> vector<4x256xf32>
    %163 = vector.broadcast %49 : vector<4x1xf32> to vector<4x256xf32>
    %164 = arith.addf %162, %163 : vector<4x256xf32>
    %c1_69 = arith.constant 1 : index
    %c0_70 = arith.constant 0 : index
    %c0_71 = arith.constant 0 : index
    %165 = vector.load %arg5[%c1_69, %c0_70, %c0_71] : memref<2x4x256xf32, #tpu.memory_space<vmem>>, vector<1x4x256xf32>
    %166 = vector.shape_cast %165 : vector<1x4x256xf32> to vector<4x256xf32>
    %167 = vector.shape_cast %164 : vector<4x256xf32> to vector<1x4x256xf32>
    tpu.vector_store %arg5[%c1_69, %c0_70, %c0_71], %167 {strides = array<i32>} : memref<2x4x256xf32, #tpu.memory_space<vmem>>, vector<1x4x256xf32>,
    return
  }
}

</mosaic_0001>

<bundles_post_ra>
// kernel: _forward_impl.1
= control target key start
LH: loop header
LB: loop body
LE: loop exit
PB: predicated region body
PF: predicated region fallthrough
CT: control target
= control target key end

     0   :  { %10 = vsyncpa [#allocation3], 0  ;;  %s1576_s21 = smov [#allocation2]   ;;  %s1577_s23 = smov 128   ;;  %s2008_s0 = inlined_call_operand.vmem [shape: f32[2,32], index: 0, kind: input, shape index: {}]   ;;  %s2009_s1 = inlined_call_operand.vmem [shape: f32[2,4,256], index: 1, kind: input, shape index: {}]   ;;  %s2010_s2 = inlined_call_operand.vmem [shape: f32[32,2], index: 2, kind: input, shape index: {}]   ;;  %s2011_s3 = inlined_call_operand.vmem [shape: f32[2,8,32], index: 3, kind: input, shape index: {}]   ;;  %s2012_s4 = inlined_call_operand.hbm [shape: f32[288,128], index: 4, kind: input, shape index: {}]   ;;  %s2013_s5 = inlined_call_operand.vmem [shape: f32[2,4,256], index: 5, kind: output, shape index: {}]  }
   0x1   :  { %s23_s20 = sshll.u32 %s2012_s4, 4  ;;  %s25_s22 = sshll.u32 %s1576_s21, 4  ;;  %s24_s20 = int_to_ptr.hbm [resolvable:$true] %s23_s20  ;;  %s26_s22 = int_to_ptr.vmem [resolvable:$true] %s25_s22 }
   0x2   :  { %s1578_s24 = smov 8  }
   0x3   :  { %31 = dma.hbm_to_vmem [thread:$0]  %s24_s20, 4608, %s26_s22, [#allocation3], %s1577_s23, %s1577_s23, %s1578_s24  }
   0x4   :  { %1574 = dma.done.wait [#allocation3], 4608  }
   0x5   :  { %1575 = vsyncadd [#allocation3], 4294962688  ;;  %v40_v0 = vld [vmem:[#allocation2 + $0x18] sm:$0xff]  ;;  %v39_v1 = vld [vmem:[#allocation2 + $0x10] sm:$0xff]  ;;  %vm41_vm0 = vcmask 261120   ;;  %vm97_vm1 = vcmask 1043456  }
   0x6   :  { %57 = vmatpush.msra.mxu0 %v40_v0  ;;  %v235_v2 = vld [vmem:[%s2009_s1] sm:$0xff]  ;;  %v38_v3 = vld [vmem:[#allocation2 + $0x8] sm:$0xff]  ;;  %v147_v4 = vld [vmem:[%s2010_s2 + $0x18] sm:$0xff]  ;;  %vm256_vm2 = vcmask 31744   ;;  %v1579_v18 = vmov 1   ;;  %s1580_s11 = smov 64  }
   0x7   :  { %253 = vst [vmem:[#allocation1] ss:$2 sm:$0xff] %v235_v2  ;;  %196 = vmatpush.msra.mxu1 %v147_v4  ;;  %v37_v5 = vld [vmem:[#allocation2] sm:$0xff]  ;;  %v36_v6 = vld [vmem:[%s2008_s0] sm:$0x3]  ;;  %v146_v9 = vld [vmem:[%s2010_s2 + $0x10] sm:$0xff]  ;;  %1506 = vset.pattern.permute.xlu0 %v1579_v18 }
   0x8   :  { %58 = vmatpush.msra.mxu0 %v39_v1  ;;  %v1629_v7 = vld [vmem:[#allocation2 + $0x38] sm:$0xff]  ;;  %v145_v10 = vld [vmem:[%s2010_s2 + $0x8] sm:$0xff]  ;;  %v1648_v14 = vld [vmem:[#allocation2 + $0x48] sm:$0xff]  ;;  %1507 = vset.pattern.permute.xlu1 %v1579_v18  ;;  %s1581_s12 = smov 32   ;;  %s1582_s13 = smov 96   ;;  %v1583_v39 = vmov 0  }
   0x9   :  { %v1640_v11 = vld [vmem:[#allocation2 + $0x40] sm:$0xff]  ;;  %197 = vmatpush.msra.mxu1 %v146_v9  ;;  %v144_v12 = vld [vmem:[%s2010_s2] sm:$0xff]  ;;  %v1652_v16 = vld [vmem:[#allocation2 + $0xb0] sm:$0xff]  ;;  %1508 = vset.pattern.permute.xlu2 %v1579_v18  ;;  %vm91_vm3 = vcmask 1040384   ;;  %vm93_vm4 = vcmask 1041408   ;;  %vm95_vm5 = vcmask 1042432  }
   0xa   :  { %59 = vmatpush.msra.mxu0 %v38_v3  ;;  %v140_v13 = vld [vmem:[#allocation2 + $0x58] sm:$0xff]  ;;  %v141_v15 = vld [vmem:[#allocation2 + $0x60] sm:$0xff]  ;;  %v1655_v17 = vld [vmem:[#allocation2 + $0xa8] sm:$0xff]  ;;  %vm99_vm6 = vcmask 1044480   ;;  %vm101_vm7 = vcmask 1045504   ;;  %vm103_vm8 = vcmask 1046528  }
   0xb   :  { %198 = vmatpush.msra.mxu1 %v145_v10  ;;  %v1659_v19 = vld [vmem:[#allocation2 + $0x50] sm:$0xff]  ;;  %v1663_v20 = vld [vmem:[#allocation2 + $0xa0] sm:$0xff]  ;;  %v1668_v21 = vld [vmem:[#allocation2 + $0x98] sm:$0xff]  ;;  %v1584_v9 = vmov 32.0   ;;  %vm643_vm13 = vcmask 130048  }
   0xc   :  { %60 = vmatpush.msra.mxu0 %v37_v5  ;;  %v142_v22 = vld [vmem:[#allocation2 + $0x68] sm:$0xff]  ;;  %v429_v23 = vld [vmem:[%s2011_s3] sm:$0xff]  ;;  %v143_v24 = vld [vmem:[#allocation2 + $0x70] sm:$0xff]  ;;  %1514 = vrcp.f32 %v1584_v9 }
   0xd   :  { %1399 = vmatmul.msk.f32.vlgmr.msra.gmra.mxu0 %vm41_vm0, %v36_v6  ;;  %199 = vmatpush.msra.mxu1 %v144_v12  ;;  %v150_v32 = vld [vmem:[#allocation2 + $0x110] sm:$0xff]  ;;  %v149_v33 = vld [vmem:[#allocation2 + $0x108] sm:$0xff]  ;;  %v151_v34 = vld [vmem:[#allocation2 + $0x118] sm:$0xff] }
   0xe   :  { %v255_v8 = vld.sshfl [vmem:[#allocation1 + $0x8] sm:$0xff pattern:$0x75316420]  ;;  %1400 = vmatmul.msk.f32.vlgmr.msra.gmra.mxu1 %vm41_vm0, %v140_v13  ;;  %v254_v36 = vld.sshfl [vmem:[#allocation1] sm:$0xff pattern:$0x75316420] }
   0xf   :  { %1409 = vmatpush.msk.msra.mxu3 %vm97_vm1, %v255_v8  ;;  %v148_v35 = vld [vmem:[#allocation2 + $0x100] sm:$0xff]  ;;  %1404 = vmatpush.msk.msra.mxu2 %vm97_vm1, %v254_v36 }
  0x10   :  { %1410 = vmatmul.msk.f32.vlgmr.msra.gmra.mxu3 %vm256_vm2, %v1629_v7  ;;  %1405 = vmatmul.msk.f32.vlgmr.msra.gmra.mxu2 %vm256_vm2, %v1629_v7  ;;  %v1448_v37 = vld [vmem:[%s2009_s1 + $0x8] sm:$0xff] }
  0x11   :  { %445 = vmatpush.msrb.mxu3 %v1652_v16  ;;  %849 = vst [vmem:[#allocation1] ss:$2 sm:$0xff] %v1448_v37  ;;  %v105_v54 = vld [vmem:[#allocation2 + $0x20] sm:$0xff] }
  0x12   :  { %v1515_v12 = vpop.eup %1514 }
  0x13   :  { %446 = vmatpush.msrb.mxu3 %v1655_v17  ;;  %v111_v13 = vmul.f32 32.0, %v1515_v12  ;;  %vm115_vm9 = vweird.f32 %v1515_v12 }
  0x15   :  { %447 = vmatpush.msrb.mxu3 %v1663_v20 }
  0x16   :  { %1401 = vmatmul.msk.f32.gmra.mxu1 %vm41_vm0, %v141_v15 }
  0x17   :  { %448 = vmatpush.msrb.mxu3 %v1668_v21 }
  0x18   :  { %1411 = vmatmul.msk.f32.gmra.mxu3 %vm256_vm2, %v1640_v11  ;;  %1406 = vmatmul.msk.f32.gmra.mxu2 %vm256_vm2, %v1640_v11 }
  0x1e   :  { %1402 = vmatmul.msk.f32.gmra.mxu1 %vm41_vm0, %v142_v22 }
  0x20   :  { %1412 = vmatmul.msk.f32.gmra.mxu3 %vm256_vm2, %v1648_v14  ;;  %1407 = vmatmul.msk.f32.gmra.mxu2 %vm256_vm2, %v1648_v14 }
  0x26   :  { %1403 = vmatmul.msk.f32.gmra.mxu1 %vm41_vm0, %v143_v24 }
  0x28   :  { %1413 = vmatmul.msk.f32.gmra.mxu3 %vm256_vm2, %v1659_v19  ;;  %1408 = vmatmul.msk.f32.gmra.mxu2 %vm256_vm2, %v1659_v19 }
  0x30   :  { %1422 = vmatmul.msk.f32.vlgmr.msrb.gmra.mxu3 %vm41_vm0, %v429_v23  ;;  %v112_v23 = vsub.f32 1.0, %v111_v13 }
  0x32   :  { %v113_v24 = vmul.f32 %v1515_v12, %v112_v23 }
  0x8a   :  { %v62_v25 = vpop.f32.mrf.mxu0 }
  0x8b   :  { %v83_v26 = vrot.slane %v62_v25, 3  ;;  %v74_v27 = vrot.slane %v62_v25, 5  ;;  %v66_v28 = vrot.slane %v62_v25, 7  ;;  %v87_v29 = vrot.slane %v62_v25, 2  ;;  %v201_v38 = vpop.f32.mrf.mxu1 }
  0x8c   :  { %v79_v30 = vrot.slane %v62_v25, 4  ;;  %v70_v31 = vrot.slane %v62_v25, 6 }
  0x8d   :  { %84 = vrot.lane.b32.xlu2 %v83_v26, %s1580_s11  ;;  %75 = vrot.lane.b32.xlu1 %v74_v27, %s1581_s12 }
  0x8e   :  { %67 = vrot.lane.b32.xlu0 %v66_v28, %s1582_s13 }
  0x93   :  { %v204_v40 = vpop.f32.mrf.mxu1  ;;  %v1690_v42 = vpop.f32.mrf.mxu3 }
  0x94   :  { %v290_v10 = vpop.f32.mrf.mxu2 }
  0x95   :  { %88 = vrot.lane.b32.xlu2 %v87_v29, %s1581_s12  ;;  %80 = vrot.lane.b32.xlu1 %v79_v30, %s1582_s13 }
  0x96   :  { %71 = vrot.lane.b32.xlu0 %v70_v31, %s1580_s11 }
  0x9b   :  { %v207_v45 = vpop.f32.mrf.mxu1  ;;  %v1694_v50 = vpop.f32.mrf.mxu3 }
  0x9c   :  { %v293_v15 = vpop.f32.mrf.mxu2 }
  0x9d   :  { %164 = vperm.xlu1 %1507, %v150_v32   ;;  %159 = vperm.xlu2 %1508, %v149_v33  }
  0x9e   :  { %169 = vperm.xlu0 %1506, %v151_v34  }
  0xa3   :  { %v210_v58 = vpop.f32.mrf.mxu1  ;;  %v325_v0 = vpop.f32.mrf.mxu3 }
  0xa4   :  { %v296_v26 = vpop.f32.mrf.mxu2 }
  0xa5   :  { %154 = vperm.xlu1 %1507, %v148_v35  }
  0xa6   :  { %1509 = vset.pattern.permute.xlu0 %v1583_v39 }
  0xa7   :  { %249 = vperm.xlu0 %1509, %v151_v34  }
  0xab   :  { %v328_v5 = vpop.f32.mrf.mxu3 }
  0xad   :  { %1510 = vset.pattern.permute.xlu1 %v1583_v39 }
  0xae   :  { %245 = vperm.xlu1 %1510, %v150_v32  }
  0xaf   :  { %241 = vperm.xlu0 %1509, %v149_v33   ;;  %v299_v33 = vpop.f32.mrf.mxu2 }
  0xb3   :  { %v1701_v8 = vpop.f32.mrf.mxu3 }
  0xb7   :  { %237 = vperm.xlu0 %1509, %v148_v35  }
  0xe7   :  { %v85_v44 = vpop.permute.xlu2 %84 }
  0xef   :  { %v89_v55 = vpop.permute.xlu2 %88 }
  0xf7   :  { %v160_v4 = vpop.permute.xlu2 %159 }
  0xf8   :  { %v205_v6 = vadd.f32 %v204_v40, %v160_v4 }
  0xff   :  { %v76_v41 = vpop.permute.xlu1 %75 }
 0x100   :  { %v68_v43 = vpop.permute.xlu0 %67 }
 0x101   :  { %v92_v47 = vsel %vm91_vm3, %v62_v25, %v68_v43 }
 0x107   :  { %v81_v46 = vpop.permute.xlu1 %80 }
 0x108   :  { %v72_v48 = vpop.permute.xlu0 %71 }
 0x109   :  { %v94_v49 = vsel %vm93_vm4, %v92_v47, %v72_v48 }
 0x10a   :  { %v96_v51 = vsel %vm95_vm5, %v94_v49, %v76_v41 }
 0x10b   :  { %v98_v52 = vsel %vm97_vm1, %v96_v51, %v74_v27  ;;  %v114_v27 = vadd.f32 %v1515_v12, %v113_v24  ;;  %v138_v24 = vld [vmem:[#allocation2 + $0x30] sm:$0xff] }
 0x10c   :  { %v100_v53 = vsel %vm99_vm6, %v98_v52, %v81_v46 }
 0x10d   :  { %v102_v56 = vsel %vm101_vm7, %v100_v53, %v85_v44  ;;  %v116_v29 = vsel %vm115_vm9, %v1515_v12, %v114_v27 }
 0x10e   :  { %v104_v57 = vsel %vm103_vm8, %v102_v56, %v89_v55 }
 0x10f   :  { %v106_v59 = vadd.f32 %v105_v54, %v104_v57  ;;  %v165_v60 = vpop.permute.xlu1 %164 }
 0x110   :  { %v170_v61 = vpop.permute.xlu0 %169  ;;  %v208_v1 = vadd.f32 %v207_v45, %v165_v60  ;;  %v1772_v60 = vld [vmem:[#allocation2 + $0x90] sm:$0xff] }
 0x111   :  { %v107_v62 = vsel %vm41_vm0, %v106_v59, 0.0  ;;  %v211_v63 = vadd.f32 %v210_v58, %v170_v61  ;;  %v1778_v61 = vld [vmem:[#allocation2 + $0xd0] sm:$0xff] }
 0x112   :  { %108 = vadd.xlane.f32.xlu2 %v107_v62  ;;  %468 = vmatpush.msrb.mxu1 %v1778_v61  ;;  %v1781_v62 = vld [vmem:[#allocation2 + $0xc8] sm:$0xff] }
 0x113   :  { %348 = vperm.xlu1 %1510, %v211_v63  }
 0x114   :  { %469 = vmatpush.msrb.mxu1 %v1781_v62 }
 0x117   :  { %v155_v2 = vpop.permute.xlu1 %154 }
 0x118   :  { %v1698_v3 = vadd.f32 %v201_v38, %v155_v2 }
 0x119   :  { %v1706_v22 = vpop.permute.xlu0 %249 }
 0x11a   :  { %333 = vperm.xlu0 %1509, %v1698_v3   ;;  %v329_v34 = vadd.f32 %v328_v5, %v1706_v22  ;;  %v300_v35 = vadd.f32 %v299_v33, %v1706_v22 }
 0x11b   :  { %343 = vperm.xlu1 %1510, %v208_v1  }
 0x120   :  { %v1708_v25 = vpop.permute.xlu1 %245 }
 0x121   :  { %v1710_v28 = vpop.permute.xlu0 %241  ;;  %v297_v41 = vadd.f32 %v296_v26, %v1708_v25  ;;  %v326_v43 = vadd.f32 %v325_v0, %v1708_v25  ;;  %v1786_v0 = vld [vmem:[#allocation2 + $0xb8] sm:$0xff] }
 0x122   :  { %v294_v48 = vadd.f32 %v293_v15, %v1710_v28  ;;  %v323_v49 = vadd.f32 %v1694_v50, %v1710_v28  ;;  %v1751_v50 = vld [vmem:[#allocation2 + $0x78] sm:$0xff]  ;;  %v136_v15 = vld [vmem:[#allocation2 + $0x28] sm:$0xff] }
 0x123   :  { %338 = vperm.xlu1 %1510, %v205_v6  }
 0x129   :  { %v1718_v38 = vpop.permute.xlu0 %237 }
 0x12a   :  { %603 = vrot.lane.b32.xlu2 %v1701_v8, %s1582_s13  ;;  %v291_v51 = vadd.f32 %v290_v10, %v1718_v38  ;;  %v320_v52 = vadd.f32 %v1690_v42, %v1718_v38  ;;  %v1759_v42 = vld [vmem:[#allocation2 + $0x80] sm:$0xff] }
 0x12b   :  { %1511 = vset.pattern.permute.xlu1 %v1579_v18 }
 0x132   :  { %927 = vperm.xlu2 %1508, %v211_v63   ;;  %v1784_v63 = vld [vmem:[#allocation2 + $0xc0] sm:$0xff] }
 0x133   :  { %470 = vmatpush.msrb.mxu1 %v1784_v63 }
 0x135   :  { %471 = vmatpush.msrb.mxu1 %v1786_v0 }
 0x13a   :  { %923 = vperm.xlu2 %1508, %v208_v1  }
 0x142   :  { %919 = vperm.xlu2 %1508, %v205_v6  }
 0x185   :  { %v109_v30 = vpop.xlane.xlu2 %108  ;;  %v349_v31 = vpop.permute.xlu1 %348 }
 0x186   :  { %v117_v32 = vmul.f32 %v116_v29, %v109_v30  ;;  %v1716_v37 = vadd.f32 %v349_v31, %v329_v34  ;;  %v1720_v39 = vadd.f32 %v349_v31, %v300_v35 }
 0x188   :  { %v1714_v36 = vsub.f32 %v106_v59, %v117_v32  ;;  %412 = vmatpush.msrb.mxu2 %v1716_v37  ;;  %383 = vmatpush.msrb.mxu0 %v1720_v39  ;;  %v1766_v59 = vld [vmem:[#allocation2 + $0x88] sm:$0xff] }
 0x18a   :  { %v119_v40 = vmul.f32 %v1714_v36, %v1714_v36 }
 0x18c   :  { %v120_v44 = vsel %vm41_vm0, %v119_v40, 0.0  ;;  %v334_v53 = vpop.permute.xlu0 %333 }
 0x18d   :  { %121 = vadd.xlane.f32.xlu1 %v120_v44  ;;  %v344_v45 = vpop.permute.xlu1 %343  ;;  %v1745_v57 = vadd.f32 %v334_v53, %v291_v51  ;;  %v1747_v58 = vadd.f32 %v334_v53, %v320_v52 }
 0x18e   :  { %v1729_v46 = vadd.f32 %v344_v45, %v297_v41  ;;  %v1731_v47 = vadd.f32 %v344_v45, %v326_v43  ;;  %v604_v43 = vpop.permute.xlu2 %603 }
 0x18f   :  { %v609_v44 = vsel %vm41_vm0, %v604_v43, 0.0 }
 0x190   :  { %384 = vmatpush.msrb.mxu0 %v1729_v46  ;;  %413 = vmatpush.msrb.mxu2 %v1731_v47 }
 0x195   :  { %v339_v54 = vpop.permute.xlu1 %338 }
 0x196   :  { %v1741_v55 = vadd.f32 %v339_v54, %v294_v48  ;;  %v1743_v56 = vadd.f32 %v339_v54, %v323_v49 }
 0x198   :  { %385 = vmatpush.msrb.mxu0 %v1741_v55  ;;  %414 = vmatpush.msrb.mxu2 %v1743_v56 }
 0x19a   :  { %386 = vmatpush.msrb.mxu0 %v1745_v57  ;;  %415 = vmatpush.msrb.mxu2 %v1747_v58 }
 0x19b   :  { %1418 = vmatmul.msk.f32.vlgmr.msrb.gmra.mxu2 %vm41_vm0, %v1751_v50  ;;  %1414 = vmatmul.msk.f32.vlgmr.msrb.gmra.mxu0 %vm41_vm0, %v1751_v50 }
 0x1a3   :  { %1419 = vmatmul.msk.f32.gmra.mxu2 %vm41_vm0, %v1759_v42  ;;  %1415 = vmatmul.msk.f32.gmra.mxu0 %vm41_vm0, %v1759_v42 }
 0x1a6   :  { %915 = vperm.xlu1 %1511, %v1698_v3  }
 0x1ab   :  { %1420 = vmatmul.msk.f32.gmra.mxu2 %vm41_vm0, %v1766_v59  ;;  %1416 = vmatmul.msk.f32.gmra.mxu0 %vm41_vm0, %v1766_v59 }
 0x1b3   :  { %1421 = vmatmul.msk.f32.gmra.mxu2 %vm41_vm0, %v1772_v60  ;;  %1417 = vmatmul.msk.f32.gmra.mxu0 %vm41_vm0, %v1772_v60 }
 0x200   :  { %v122_v1 = vpop.xlane.xlu1 %121 }
 0x201   :  { %v123_v2 = vmul.f32 %v122_v1, %v116_v29 }
 0x203   :  { %v124_v3 = vadd.f32 1e-05, %v123_v2 }
 0x205   :  { %1516 = vrsqrt.f32 %v124_v3  ;;  %vm131_vm11 = vweird.f32 %v124_v3 }
 0x20b   :  { %v1517_v4 = vpop.eup %1516 }
 0x20c   :  { %v126_v5 = vmul.f32 %v1517_v4, %v124_v3  ;;  %vm132_vm10 = vweird.f32 %v1517_v4 }
 0x20d   :  { %vm133_vm12 = vmor %vm131_vm11, %vm132_vm10 }
 0x20e   :  { %v127_v6 = vmul.f32 %v1517_v4, %v126_v5 }
 0x210   :  { %v128_v9 = vmul.f32 0.5, %v127_v6 }
 0x212   :  { %v129_v10 = vsub.f32 1.5, %v128_v9 }
 0x214   :  { %v130_v12 = vmul.f32 %v1517_v4, %v129_v10 }
 0x216   :  { %v134_v13 = vsel %vm133_vm12, %v1517_v4, %v130_v12 }
 0x217   :  { %v135_v23 = vmul.f32 %v134_v13, %v1714_v36 }
 0x218   :  { %v388_v29 = vpop.f32.mrf.mxu0 }
 0x219   :  { %v137_v26 = vmul.f32 %v136_v15, %v135_v23 }
 0x21b   :  { %v1791_v27 = vadd.f32 %v138_v24, %v137_v26 }
 0x21d   :  { %1423 = vmatmul.msk.f32.vlgmr.msrb.gmra.mxu1 %vm41_vm0, %v1791_v27 }
 0x21e   :  { %v417_v30 = vpop.f32.mrf.mxu2 }
 0x220   :  { %v391_v31 = vpop.f32.mrf.mxu0 }
 0x226   :  { %v420_v32 = vpop.f32.mrf.mxu2 }
 0x228   :  { %v394_v33 = vpop.f32.mrf.mxu0 }
 0x22e   :  { %v423_v34 = vpop.f32.mrf.mxu2 }
 0x230   :  { %v397_v35 = vpop.f32.mrf.mxu0 }
 0x231   :  { %495 = vmatpush.msra.mxu3 %v397_v35 }
 0x233   :  { %496 = vmatpush.msra.mxu3 %v394_v33 }
 0x235   :  { %497 = vmatpush.msra.mxu3 %v391_v31 }
 0x236   :  { %v426_v40 = vpop.f32.mrf.mxu2 }
 0x237   :  { %518 = vmatpush.msra.mxu0 %v426_v40  ;;  %498 = vmatpush.msra.mxu3 %v388_v29 }
 0x238   :  { %1424 = vmatmul.msk.f32.vlgmr.msra.gmra.mxu3 %vm41_vm0, %v1701_v8 }
 0x239   :  { %519 = vmatpush.msra.mxu0 %v423_v34 }
 0x23b   :  { %520 = vmatpush.msra.mxu0 %v420_v32 }
 0x23d   :  { %521 = vmatpush.msra.mxu0 %v417_v30 }
 0x23e   :  { %1426 = vmatmul.msk.f32.vlgmr.msra.gmra.mxu0 %vm41_vm0, %v1701_v8 }
 0x29a   :  { %v473_v36 = vpop.f32.mrf.mxu1 }
 0x29b   :  { %v476_v41 = vsel %vm97_vm1, %v473_v36, 0.0 }
 0x29c   :  { %605 = vrot.lane.b32.xlu0 %v476_v41, %s1582_s13  ;;  %1425 = vmatmul.msk.f32.gmra.mxu3 %vm41_vm0, %v476_v41 }
 0x29d   :  { %1427 = vmatmul.msk.f32.gmra.mxu0 %vm41_vm0, %v476_v41 }
 0x2bb   :  { %v523_v45 = vpop.f32.mrf.mxu0  ;;  %v500_v49 = vpop.f32.mrf.mxu3 }
 0x2bc   :  { %v535_v48 = vrot.slane %v523_v45, 4  ;;  %v529_v52 = vrot.slane %v500_v49, 4 }
 0x2be   :  { %611 = vxpose.xlu0.b32.start [1/2] (short) (narrow) %v609_v44, 32  ;;  %v536_v51 = vmax.f32 %v523_v45, %v535_v48  ;;  %v530_v8 = vmax.f32 %v500_v49, %v529_v52 }
 0x2c0   :  { %v537_v53 = vrot.slane %v536_v51, 2  ;;  %v531_v1 = vrot.slane %v530_v8, 2 }
 0x2c2   :  { %v538_v54 = vmax.f32 %v536_v51, %v537_v53  ;;  %v532_v5 = vmax.f32 %v530_v8, %v531_v1 }
 0x2c4   :  { %v539_v2 = vrot.slane %v538_v54, 1  ;;  %v533_v9 = vrot.slane %v532_v5, 1 }
 0x2c6   :  { %v540_v6 = vmax.f32 %v538_v54, %v539_v2  ;;  %v534_v12 = vmax.f32 %v532_v5, %v533_v9 }
 0x2c8   :  { %v542_v10 = vsub.f32 %v523_v45, %v540_v6  ;;  %v541_v23 = vsub.f32 %v500_v49, %v534_v12 }
 0x2ca   :  { %v545_v13 = vmul.f32 1.442695, %v542_v10  ;;  %v543_v30 = vmul.f32 1.442695, %v541_v23 }
 0x2cc   :  { %1518 = vpow2.f32 %v545_v13 }
 0x2cd   :  { %1520 = vpow2.f32 %v543_v30 }
 0x2d2   :  { %v1519_v36 = vpop.eup %1518 }
 0x2d3   :  { %v553_v48 = vrot.slane %v1519_v36, 4  ;;  %v1521_v51 = vpop.eup %1520 }
 0x2d4   :  { %v547_v1 = vrot.slane %v1521_v51, 4 }
 0x2d5   :  { %v554_v54 = vadd.f32 %v1519_v36, %v553_v48 }
 0x2d6   :  { %v548_v5 = vadd.f32 %v1521_v51, %v547_v1 }
 0x2d8   :  { %v549_v13 = vrot.slane %v548_v5, 2 }
 0x2da   :  { %v550_v30 = vadd.f32 %v549_v13, %v548_v5  ;;  %v850_v5 = vld.sshfl [vmem:[#allocation1] sm:$0xff pattern:$0x75316420] }
 0x30e   :  { %v606_v3 = vpop.permute.xlu0 %605 }
 0x30f   :  { %v610_v4 = vsel %vm41_vm0, %v606_v3, 0.0 }
 0x310   :  { %612 = vxpose.xlu0.b32.end [2/2] (short) (narrow) %v610_v4, 32  ;;  %v555_v4 = vrot.slane %v554_v54, 2 }
 0x312   :  { %v556_v10 = vadd.f32 %v555_v4, %v554_v54 }
 0x31a   :  { %v526_v15 = vpop.f32.mrf.mxu0 }
 0x31b   :  { %v570_v24 = vsel %vm97_vm1, %v526_v15, -inf }
 0x31c   :  { %v571_v26 = vrot.slane %v570_v24, 4 }
 0x31e   :  { %v572_v29 = vmax.f32 %v570_v24, %v571_v26  ;;  %v557_v24 = vrot.slane %v556_v10, 1 }
 0x31f   :  { %v503_v31 = vpop.f32.mrf.mxu3 }
 0x320   :  { %v573_v32 = vrot.slane %v572_v29, 2  ;;  %v563_v33 = vsel %vm97_vm1, %v503_v31, -inf }
 0x321   :  { %v564_v34 = vrot.slane %v563_v33, 4 }
 0x322   :  { %v574_v35 = vmax.f32 %v572_v29, %v573_v32 }
 0x323   :  { %v565_v40 = vmax.f32 %v563_v33, %v564_v34  ;;  %v558_v34 = vadd.f32 %v557_v24, %v556_v10  ;;  %v851_v24 = vld.sshfl [vmem:[#allocation1 + $0x8] sm:$0xff pattern:$0x75316420] }
 0x324   :  { %v575_v41 = vrot.slane %v574_v35, 1 }
 0x325   :  { %v566_v43 = vrot.slane %v565_v40, 2 }
 0x326   :  { %v576_v44 = vmax.f32 %v574_v35, %v575_v41 }
 0x327   :  { %v567_v45 = vmax.f32 %v565_v40, %v566_v43  ;;  %v551_v40 = vrot.slane %v550_v30, 1 }
 0x328   :  { %v578_v49 = vsub.f32 %v526_v15, %v576_v44 }
 0x329   :  { %v568_v52 = vrot.slane %v567_v45, 1 }
 0x32a   :  { %v581_v53 = vmul.f32 1.442695, %v578_v49 }
 0x32b   :  { %v569_v8 = vmax.f32 %v567_v45, %v568_v52  ;;  %v552_v45 = vadd.f32 %v551_v40, %v550_v30 }
 0x32c   :  { %1522 = vpow2.f32 %v581_v53 }
 0x32d   :  { %v577_v2 = vsub.f32 %v503_v31, %v569_v8 }
 0x32f   :  { %v579_v3 = vmul.f32 1.442695, %v577_v2 }
 0x331   :  { %1524 = vpow2.f32 %v579_v3 }
 0x332   :  { %v1523_v6 = vpop.eup %1522  ;;  %1526 = vrcp.f32 %v558_v34 }
 0x333   :  { %v590_v9 = vsel %vm97_vm1, %v1523_v6, 0.0 }
 0x334   :  { %v591_v12 = vrot.slane %v590_v9, 4 }
 0x336   :  { %v592_v23 = vadd.f32 %v591_v12, %v590_v9 }
 0x337   :  { %v1525_v15 = vpop.eup %1524 }
 0x338   :  { %v593_v26 = vrot.slane %v592_v23, 2  ;;  %v583_v29 = vsel %vm97_vm1, %v1525_v15, 0.0  ;;  %v1527_v52 = vpop.eup %1526 }
 0x339   :  { %v584_v32 = vrot.slane %v583_v29, 4  ;;  %v562_v54 = vmul.f32 %v1527_v52, %v1519_v36 }
 0x33a   :  { %v594_v33 = vadd.f32 %v593_v26, %v592_v23  ;;  %v1832_v23 = vld [vmem:[#allocation2 + $0xd8] sm:$0xff]  ;;  %v1839_v26 = vld [vmem:[#allocation2 + $0xe0] sm:$0xff] }
 0x33b   :  { %v585_v31 = vadd.f32 %v584_v32, %v583_v29  ;;  %v1847_v29 = vld [vmem:[#allocation2 + $0xe8] sm:$0xff] }
 0x33c   :  { %v595_v35 = vrot.slane %v594_v33, 1 }
 0x33d   :  { %v586_v41 = vrot.slane %v585_v31, 2 }
 0x33e   :  { %v596_v43 = vadd.f32 %v595_v35, %v594_v33 }
 0x33f   :  { %v587_v44 = vadd.f32 %v586_v41, %v585_v31 }
 0x340   :  { %1528 = vrcp.f32 %v596_v43 }
 0x341   :  { %v588_v48 = vrot.slane %v587_v44, 1  ;;  %1530 = vrcp.f32 %v552_v45 }
 0x343   :  { %v589_v49 = vadd.f32 %v588_v48, %v587_v44  ;;  %v1883_v48 = vld [vmem:[#allocation2 + $0xf8] sm:$0xf] }
 0x345   :  { %1532 = vrcp.f32 %v589_v49 }
 0x346   :  { %v1529_v53 = vpop.eup %1528 }
 0x347   :  { %v600_v8 = vmul.f32 %v1529_v53, %v1523_v6  ;;  %v1531_v1 = vpop.eup %1530 }
 0x348   :  { %v561_v4 = vmul.f32 %v1531_v1, %v1521_v51 }
 0x349   :  { %1433 = vmatpush.msk.msrb.mxu3 %vm97_vm1, %v600_v8 }
 0x34b   :  { %v1533_v2 = vpop.eup %1532  ;;  %700 = vmatpush.msrb.mxu3 %v562_v54 }
 0x34c   :  { %v599_v3 = vmul.f32 %v1533_v2, %v1525_v15 }
 0x34d   :  { %1449 = vmatpush.msk.msra.mxu3 %vm97_vm1, %v850_v5 }
 0x34e   :  { %1428 = vmatpush.msk.msra.mxu1 %vm97_vm1, %v599_v3 }
 0x350   :  { %671 = vmatpush.msra.mxu1 %v561_v4 }
 0x3ac   :  { %v627_v9 = vpop.trf.xlu0 }
 0x3ad   :  { %1429 = vmatmul.msk.f32.vlgmr.msra.gmra.mxu1 %vm643_vm13, %v627_v9  ;;  %1434 = vmatmul.msk.f32.vlgmr.msrb.gmra.mxu3 %vm643_vm13, %v627_v9 }
 0x3ae   :  { %1013 = vmatpush.msrb.mxu3 %v1652_v16 }
 0x3b0   :  { %1014 = vmatpush.msrb.mxu3 %v1655_v17 }
 0x3b2   :  { %1015 = vmatpush.msrb.mxu3 %v1663_v20 }
 0x3b4   :  { %v628_v36 = vpop.trf.xlu0  ;;  %1016 = vmatpush.msrb.mxu3 %v1668_v21 }
 0x3b5   :  { %1430 = vmatmul.msk.f32.gmra.mxu1 %vm643_vm13, %v628_v36  ;;  %1435 = vmatmul.msk.f32.gmra.mxu3 %vm643_vm13, %v628_v36  ;;  %v1585_v36 = vmov 2  }
 0x3b6   :  { %1512 = vset.pattern.permute.xlu2 %v1585_v36 }
 0x3bc   :  { %v629_v51 = vpop.trf.xlu0 }
 0x3bd   :  { %1431 = vmatmul.msk.f32.gmra.mxu1 %vm643_vm13, %v629_v51  ;;  %1436 = vmatmul.msk.f32.gmra.mxu3 %vm643_vm13, %v629_v51 }
 0x3c4   :  { %v630_v6 = vpop.trf.xlu0 }
 0x3c5   :  { %1432 = vmatmul.msk.f32.gmra.mxu1 %vm643_vm13, %v630_v6  ;;  %1437 = vmatmul.msk.f32.gmra.mxu3 %vm643_vm13, %v630_v6 }
 0x3cd   :  { %1450 = vmatmul.msk.f32.vlgmr.msra.gmra.mxu3 %vm256_vm2, %v1629_v7 }
 0x3d5   :  { %1451 = vmatmul.msk.f32.gmra.mxu3 %vm256_vm2, %v1640_v11 }
 0x3dd   :  { %1452 = vmatmul.msk.f32.gmra.mxu3 %vm256_vm2, %v1648_v14 }
 0x3e5   :  { %1453 = vmatmul.msk.f32.gmra.mxu3 %vm256_vm2, %v1659_v19 }
 0x42a   :  { %v673_v16 = vpop.f32.mrf.mxu1 }
 0x430   :  { %v702_v17 = vpop.f32.mrf.mxu3 }
 0x432   :  { %v676_v20 = vpop.f32.mrf.mxu1 }
 0x438   :  { %v705_v21 = vpop.f32.mrf.mxu3 }
 0x43a   :  { %v679_v10 = vpop.f32.mrf.mxu1 }
 0x440   :  { %v708_v12 = vpop.f32.mrf.mxu3 }
 0x442   :  { %v682_v13 = vpop.f32.mrf.mxu1 }
 0x443   :  { %738 = vmatpush.msrb.mxu0 %v682_v13 }
 0x445   :  { %739 = vmatpush.msrb.mxu0 %v679_v10 }
 0x447   :  { %740 = vmatpush.msrb.mxu0 %v676_v20 }
 0x448   :  { %v711_v15 = vpop.f32.mrf.mxu3 }
 0x449   :  { %741 = vmatpush.msrb.mxu0 %v673_v16  ;;  %767 = vmatpush.msra.mxu2 %v711_v15 }
 0x44a   :  { %1438 = vmatmul.msk.f32.vlgmr.msrb.gmra.mxu0 %vm41_vm0, %v1832_v23 }
 0x44b   :  { %768 = vmatpush.msra.mxu2 %v708_v12  ;;  %1454 = vmatpush.msk.msra.mxu0 %vm97_vm1, %v851_v24 }
 0x44d   :  { %1036 = vmatpush.msrb.mxu0 %v1778_v61  ;;  %769 = vmatpush.msra.mxu2 %v705_v21  ;;  %v1467_v61 = vld [vmem:[%s2011_s3 + $0x8] sm:$0xff] }
 0x44e   :  { %1468 = vmatmul.msk.f32.vlgmr.msrb.gmra.mxu3 %vm41_vm0, %v1467_v61 }
 0x44f   :  { %1037 = vmatpush.msrb.mxu0 %v1781_v62  ;;  %770 = vmatpush.msra.mxu2 %v702_v17  ;;  %v1857_v62 = vld [vmem:[#allocation2 + $0xf0] sm:$0xff] }
 0x450   :  { %1442 = vmatmul.msk.f32.vlgmr.msra.gmra.mxu2 %vm41_vm0, %v1832_v23 }
 0x451   :  { %1038 = vmatpush.msrb.mxu0 %v1784_v63  ;;  %v1021_v63 = vrot.slane %v1791_v27, 4  ;;  %v928_v27 = vpop.permute.xlu2 %927 }
 0x452   :  { %1439 = vmatmul.msk.f32.gmra.mxu0 %vm41_vm0, %v1839_v26 }
 0x453   :  { %1039 = vmatpush.msrb.mxu0 %v1786_v0  ;;  %v873_v0 = vpop.f32.mrf.mxu3 }
 0x458   :  { %1443 = vmatmul.msk.f32.gmra.mxu2 %vm41_vm0, %v1839_v26 }
 0x459   :  { %v924_v52 = vpop.permute.xlu2 %923 }
 0x45a   :  { %1440 = vmatmul.msk.f32.gmra.mxu0 %vm41_vm0, %v1847_v29 }
 0x45b   :  { %v876_v30 = vpop.f32.mrf.mxu3 }
 0x45c   :  { %v877_v2 = vadd.f32 %v876_v30, %v1710_v28 }
 0x460   :  { %1444 = vmatmul.msk.f32.gmra.mxu2 %vm41_vm0, %v1847_v29 }
 0x462   :  { %1441 = vmatmul.msk.f32.gmra.mxu0 %vm41_vm0, %v1857_v62 }
 0x463   :  { %v879_v33 = vpop.f32.mrf.mxu3 }
 0x464   :  { %v880_v54 = vadd.f32 %v879_v33, %v1708_v25 }
 0x468   :  { %1445 = vmatmul.msk.f32.gmra.mxu2 %vm41_vm0, %v1857_v62 }
 0x46a   :  { %1455 = vmatmul.msk.f32.vlgmr.msra.gmra.mxu0 %vm256_vm2, %v1629_v7 }
 0x46b   :  { %v882_v35 = vpop.f32.mrf.mxu3 }
 0x472   :  { %1456 = vmatmul.msk.f32.gmra.mxu0 %vm256_vm2, %v1640_v11 }
 0x47a   :  { %1457 = vmatmul.msk.f32.gmra.mxu0 %vm256_vm2, %v1648_v14 }
 0x482   :  { %1458 = vmatmul.msk.f32.gmra.mxu0 %vm256_vm2, %v1659_v19 }
 0x48a   :  { %1469 = vmatmul.msk.f32.vlgmr.msrb.gmra.mxu0 %vm41_vm0, %v1021_v63 }
 0x4c7   :  { %v743_v32 = vpop.f32.mrf.mxu0 }
 0x4c8   :  { %v784_v45 = vadd.f32 %v743_v32, %v1745_v57 }
 0x4cf   :  { %v746_v31 = vpop.f32.mrf.mxu0 }
 0x4d0   :  { %v786_v44 = vadd.f32 %v746_v31, %v1741_v55  ;;  %v883_v55 = vadd.f32 %v882_v35, %v1706_v22 }
 0x4d1   :  { %v1876_v14 = vpop.f32.mrf.mxu3 }
 0x4d2   :  { %1171 = vrot.lane.b32.xlu2 %v1876_v14, %s1582_s13  ;;  %v1894_v3 = vadd.f32 %v928_v27, %v883_v55 }
 0x4d3   :  { %v772_v34 = vpop.f32.mrf.mxu2 }
 0x4d4   :  { %v785_v1 = vadd.f32 %v772_v34, %v1747_v58  ;;  %v916_v58 = vpop.permute.xlu1 %915 }
 0x4d7   :  { %v749_v7 = vpop.f32.mrf.mxu0 }
 0x4d8   :  { %v788_v19 = vadd.f32 %v749_v7, %v1729_v46 }
 0x4db   :  { %v775_v40 = vpop.f32.mrf.mxu2 }
 0x4dc   :  { %v787_v57 = vadd.f32 %v775_v40, %v1743_v56  ;;  %v920_v56 = vpop.permute.xlu2 %919 }
 0x4dd   :  { %v1902_v5 = vadd.f32 %v920_v56, %v877_v2 }
 0x4df   :  { %v752_v11 = vpop.f32.mrf.mxu0 }
 0x4e0   :  { %v790_v41 = vadd.f32 %v752_v11, %v1720_v39 }
 0x4e2   :  { %812 = vmatpush.msrb.mxu1 %v790_v41 }
 0x4e3   :  { %v778_v43 = vpop.f32.mrf.mxu2 }
 0x4e4   :  { %813 = vmatpush.msrb.mxu1 %v788_v19  ;;  %v789_v53 = vadd.f32 %v778_v43, %v1731_v47  ;;  %v1899_v47 = vadd.f32 %v924_v52, %v880_v54 }
 0x4e6   :  { %814 = vmatpush.msrb.mxu1 %v786_v44 }
 0x4e7   :  { %v902_v49 = vpop.f32.mrf.mxu0 }
 0x4e8   :  { %815 = vmatpush.msrb.mxu1 %v784_v45  ;;  %v903_v21 = vadd.f32 %v902_v49, %v1718_v38 }
 0x4e9   :  { %1446 = vmatmul.msk.f32.vlgmr.msrb.gmra.mxu1 %vm41_vm0, %v1883_v48 }
 0x4ea   :  { %v1925_v13 = vadd.f32 %v916_v58, %v903_v21 }
 0x4eb   :  { %v781_v39 = vpop.f32.mrf.mxu2 }
 0x4ec   :  { %v791_v46 = vadd.f32 %v781_v39, %v1716_v37  ;;  %v874_v37 = vadd.f32 %v873_v0, %v1718_v38 }
 0x4ee   :  { %832 = vmatpush.msra.mxu1 %v791_v46  ;;  %v1905_v9 = vadd.f32 %v916_v58, %v874_v37 }
 0x4ef   :  { %v905_v8 = vpop.f32.mrf.mxu0 }
 0x4f0   :  { %833 = vmatpush.msra.mxu1 %v789_v53  ;;  %v906_v17 = vadd.f32 %v905_v8, %v1710_v28  ;;  %v234_v28 = vld [vmem:[#allocation2 + $0x100] sm:$0xf] }
 0x4f2   :  { %834 = vmatpush.msra.mxu1 %v787_v57  ;;  %v1922_v12 = vadd.f32 %v920_v56, %v906_v17 }
 0x4f4   :  { %835 = vmatpush.msra.mxu1 %v785_v1 }
 0x4f5   :  { %1447 = vmatmul.msk.f32.vlgmr.msra.gmra.mxu1 %vm41_vm0, %v1883_v48 }
 0x4f6   :  { %950 = vmatpush.msrb.mxu1 %v1894_v3 }
 0x4f7   :  { %v908_v4 = vpop.f32.mrf.mxu0 }
 0x4f8   :  { %951 = vmatpush.msrb.mxu1 %v1899_v47  ;;  %v909_v6 = vadd.f32 %v908_v4, %v1708_v25 }
 0x4fa   :  { %952 = vmatpush.msrb.mxu1 %v1902_v5  ;;  %v1917_v10 = vadd.f32 %v924_v52, %v909_v6 }
 0x4fc   :  { %953 = vmatpush.msrb.mxu1 %v1905_v9 }
 0x4fd   :  { %1459 = vmatmul.msk.f32.vlgmr.msrb.gmra.mxu1 %vm41_vm0, %v1751_v50 }
 0x4ff   :  { %v911_v51 = vpop.f32.mrf.mxu0 }
 0x500   :  { %v912_v16 = vadd.f32 %v911_v51, %v1706_v22 }
 0x502   :  { %v1914_v20 = vadd.f32 %v928_v27, %v912_v16 }
 0x504   :  { %979 = vmatpush.msrb.mxu2 %v1914_v20 }
 0x505   :  { %1460 = vmatmul.msk.f32.gmra.mxu1 %vm41_vm0, %v1759_v42 }
 0x506   :  { %980 = vmatpush.msrb.mxu2 %v1917_v10 }
 0x507   :  { %v1041_v25 = vpop.f32.mrf.mxu0 }
 0x508   :  { %v1044_v22 = vsel %vm97_vm1, %v1041_v25, 0.0  ;;  %981 = vmatpush.msrb.mxu2 %v1922_v12 }
 0x509   :  { %1173 = vrot.lane.b32.xlu2 %v1044_v22, %s1582_s13 }
 0x50a   :  { %982 = vmatpush.msrb.mxu2 %v1925_v13 }
 0x50b   :  { %1463 = vmatmul.msk.f32.vlgmr.msrb.gmra.mxu2 %vm41_vm0, %v1751_v50 }
 0x50d   :  { %1461 = vmatmul.msk.f32.gmra.mxu1 %vm41_vm0, %v1766_v59 }
 0x511   :  { %794 = vperm.xlu2 %1512, %v234_v28  }
 0x513   :  { %1464 = vmatmul.msk.f32.gmra.mxu2 %vm41_vm0, %v1759_v42 }
 0x515   :  { %1462 = vmatmul.msk.f32.gmra.mxu1 %vm41_vm0, %v1772_v60 }
 0x51b   :  { %1465 = vmatmul.msk.f32.gmra.mxu2 %vm41_vm0, %v1766_v59 }
 0x523   :  { %1466 = vmatmul.msk.f32.gmra.mxu2 %vm41_vm0, %v1772_v60 }
 0x52c   :  { %v1172_v38 = vpop.permute.xlu2 %1171 }
 0x52d   :  { %v1177_v50 = vsel %vm41_vm0, %v1172_v38, 0.0 }
 0x52e   :  { %1179 = vxpose.xlu0.b32.start [1/2] (short) (narrow) %v1177_v50, 32 }
 0x563   :  { %v1174_v15 = vpop.permute.xlu2 %1173 }
 0x564   :  { %v1178_v24 = vsel %vm41_vm0, %v1174_v15, 0.0 }
 0x565   :  { %1180 = vxpose.xlu0.b32.end [2/2] (short) (narrow) %v1178_v24, 32 }
 0x566   :  { %v817_v61 = vpop.f32.mrf.mxu1 }
 0x56b   :  { %v1945_v63 = vpop.permute.xlu2 %794 }
 0x56c   :  { %v818_v0 = vadd.f32 %v817_v61, %v1945_v63 }
 0x572   :  { %v837_v42 = vpop.f32.mrf.mxu1 }
 0x573   :  { %v838_v30 = vadd.f32 %v837_v42, %v1945_v63 }
 0x575   :  { %v842_v59 = vrot.slane %v838_v30, 4 }
 0x577   :  { %v843_v32 = vsel %vm97_vm1, %v818_v0, %v842_v59 }
 0x578   :  { %845 = vst [vmem:[%s2013_s5] sm:$0xff] %v843_v32 }
 0x57a   :  { %v955_v60 = vpop.f32.mrf.mxu1 }
 0x582   :  { %v958_v33 = vpop.f32.mrf.mxu1 }
 0x58a   :  { %v961_v31 = vpop.f32.mrf.mxu1 }
 0x58e   :  { %v984_v34 = vpop.f32.mrf.mxu2 }
 0x592   :  { %v964_v7 = vpop.f32.mrf.mxu1 }
 0x593   :  { %1063 = vmatpush.msra.mxu1 %v964_v7 }
 0x595   :  { %1064 = vmatpush.msra.mxu1 %v961_v31 }
 0x596   :  { %v987_v35 = vpop.f32.mrf.mxu2 }
 0x597   :  { %1065 = vmatpush.msra.mxu1 %v958_v33 }
 0x599   :  { %1066 = vmatpush.msra.mxu1 %v955_v60 }
 0x59a   :  { %1470 = vmatmul.msk.f32.vlgmr.msra.gmra.mxu1 %vm41_vm0, %v1876_v14 }
 0x59e   :  { %v990_v40 = vpop.f32.mrf.mxu2 }
 0x5a2   :  { %1471 = vmatmul.msk.f32.gmra.mxu1 %vm41_vm0, %v1044_v22 }
 0x5a6   :  { %v993_v11 = vpop.f32.mrf.mxu2 }
 0x5a7   :  { %1086 = vmatpush.msra.mxu2 %v993_v11 }
 0x5a9   :  { %1087 = vmatpush.msra.mxu2 %v990_v40 }
 0x5ab   :  { %1088 = vmatpush.msra.mxu2 %v987_v35 }
 0x5ad   :  { %1089 = vmatpush.msra.mxu2 %v984_v34 }
 0x5ae   :  { %1472 = vmatmul.msk.f32.vlgmr.msra.gmra.mxu2 %vm41_vm0, %v1876_v14 }
 0x5b6   :  { %1473 = vmatmul.msk.f32.gmra.mxu2 %vm41_vm0, %v1044_v22 }
 0x5cc   :  { %1513 = vset.pattern.permute.xlu0 %v1579_v18 }
 0x617   :  { %v1068_v41 = vpop.f32.mrf.mxu1 }
 0x618   :  { %v1097_v19 = vrot.slane %v1068_v41, 4 }
 0x61a   :  { %v1098_v27 = vmax.f32 %v1068_v41, %v1097_v19 }
 0x61c   :  { %v1099_v43 = vrot.slane %v1098_v27, 2 }
 0x61e   :  { %v1100_v44 = vmax.f32 %v1098_v27, %v1099_v43  ;;  %v1195_v43 = vpop.trf.xlu0 }
 0x61f   :  { %v1071_v45 = vpop.f32.mrf.mxu1 }
 0x620   :  { %v1101_v49 = vrot.slane %v1100_v44, 1  ;;  %v1131_v39 = vsel %vm97_vm1, %v1071_v45, -inf }
 0x621   :  { %v1132_v46 = vrot.slane %v1131_v39, 4 }
 0x622   :  { %v1102_v52 = vmax.f32 %v1100_v44, %v1101_v49 }
 0x623   :  { %v1133_v53 = vmax.f32 %v1131_v39, %v1132_v46 }
 0x624   :  { %v1109_v8 = vsub.f32 %v1068_v41, %v1102_v52 }
 0x625   :  { %v1134_v55 = vrot.slane %v1133_v53, 2 }
 0x626   :  { %v1111_v57 = vmul.f32 1.442695, %v1109_v8 }
 0x627   :  { %v1135_v14 = vmax.f32 %v1133_v53, %v1134_v55 }
 0x628   :  { %1534 = vpow2.f32 %v1111_v57 }
 0x629   :  { %v1136_v54 = vrot.slane %v1135_v14, 1 }
 0x62b   :  { %v1137_v1 = vmax.f32 %v1135_v14, %v1136_v54  ;;  %v1196_v14 = vpop.trf.xlu0 }
 0x62d   :  { %v1145_v18 = vsub.f32 %v1071_v45, %v1137_v1 }
 0x62e   :  { %v1535_v2 = vpop.eup %1534 }
 0x62f   :  { %v1147_v37 = vmul.f32 1.442695, %v1145_v18  ;;  %v1115_v56 = vrot.slane %v1535_v2, 4 }
 0x631   :  { %1536 = vpow2.f32 %v1147_v37  ;;  %v1091_v4 = vpop.f32.mrf.mxu2  ;;  %v1116_v58 = vadd.f32 %v1535_v2, %v1115_v56 }
 0x632   :  { %v1103_v36 = vrot.slane %v1091_v4, 4 }
 0x633   :  { %v1117_v6 = vrot.slane %v1116_v58, 2 }
 0x634   :  { %v1104_v51 = vmax.f32 %v1091_v4, %v1103_v36 }
 0x635   :  { %v1118_v22 = vadd.f32 %v1117_v6, %v1116_v58 }
 0x636   :  { %v1105_v16 = vrot.slane %v1104_v51, 2 }
 0x637   :  { %v1537_v17 = vpop.eup %1536  ;;  %v1119_v0 = vrot.slane %v1118_v22, 1 }
 0x638   :  { %v1151_v21 = vsel %vm97_vm1, %v1537_v17, 0.0  ;;  %v1106_v25 = vmax.f32 %v1104_v51, %v1105_v16  ;;  %v1197_v51 = vpop.trf.xlu0 }
 0x639   :  { %v1152_v28 = vrot.slane %v1151_v21, 4  ;;  %v1094_v38 = vpop.f32.mrf.mxu2  ;;  %v1120_v34 = vadd.f32 %v1119_v0, %v1118_v22 }
 0x63a   :  { %v1107_v50 = vrot.slane %v1106_v25, 1  ;;  %v1138_v15 = vsel %vm97_vm1, %v1094_v38, -inf }
 0x63b   :  { %v1153_v24 = vadd.f32 %v1152_v28, %v1151_v21  ;;  %v1139_v61 = vrot.slane %v1138_v15, 4 }
 0x63c   :  { %v1108_v42 = vmax.f32 %v1106_v25, %v1107_v50 }
 0x63d   :  { %v1154_v30 = vrot.slane %v1153_v24, 2  ;;  %v1140_v59 = vmax.f32 %v1138_v15, %v1139_v61 }
 0x63e   :  { %v1110_v32 = vsub.f32 %v1091_v4, %v1108_v42 }
 0x63f   :  { %v1155_v60 = vadd.f32 %v1154_v30, %v1153_v24  ;;  %v1141_v33 = vrot.slane %v1140_v59, 2 }
 0x640   :  { %v1113_v31 = vmul.f32 1.442695, %v1110_v32  ;;  %v1198_v21 = vpop.trf.xlu0 }
 0x641   :  { %v1156_v7 = vrot.slane %v1155_v60, 1  ;;  %v1142_v35 = vmax.f32 %v1140_v59, %v1141_v33 }
 0x642   :  { %1538 = vpow2.f32 %v1113_v31 }
 0x643   :  { %v1157_v40 = vadd.f32 %v1156_v7, %v1155_v60  ;;  %v1143_v11 = vrot.slane %v1142_v35, 1  ;;  %1540 = vrcp.f32 %v1120_v34 }
 0x645   :  { %1542 = vrcp.f32 %v1157_v40  ;;  %v1144_v41 = vmax.f32 %v1142_v35, %v1143_v11 }
 0x647   :  { %v1146_v19 = vsub.f32 %v1094_v38, %v1144_v41 }
 0x648   :  { %v1539_v27 = vpop.eup %1538 }
 0x649   :  { %v1149_v44 = vmul.f32 1.442695, %v1146_v19  ;;  %v1121_v45 = vrot.slane %v1539_v27, 4  ;;  %v1541_v49 = vpop.eup %1540 }
 0x64a   :  { %v1129_v53 = vmul.f32 %v1541_v49, %v1535_v2 }
 0x64b   :  { %v1543_v39 = vpop.eup %1542  ;;  %1544 = vpow2.f32 %v1149_v44  ;;  %v1122_v46 = vadd.f32 %v1539_v27, %v1121_v45 }
 0x64c   :  { %v1167_v52 = vmul.f32 %v1543_v39, %v1537_v17 }
 0x64d   :  { %v1123_v8 = vrot.slane %v1122_v46, 2 }
 0x64e   :  { %1474 = vmatpush.msk.msra.mxu3 %vm97_vm1, %v1167_v52 }
 0x64f   :  { %v1124_v54 = vadd.f32 %v1123_v8, %v1122_v46 }
 0x650   :  { %1238 = vmatpush.msra.mxu3 %v1129_v53 }
 0x651   :  { %v1545_v55 = vpop.eup %1544  ;;  %1475 = vmatmul.msk.f32.vlgmr.msra.gmra.mxu3 %vm643_vm13, %v1195_v43  ;;  %v1125_v37 = vrot.slane %v1124_v54, 1 }
 0x652   :  { %v1158_v57 = vsel %vm97_vm1, %v1545_v55, 0.0 }
 0x653   :  { %v1159_v1 = vrot.slane %v1158_v57, 4  ;;  %v1126_v58 = vadd.f32 %v1125_v37, %v1124_v54 }
 0x655   :  { %v1160_v18 = vadd.f32 %v1159_v1, %v1158_v57  ;;  %1546 = vrcp.f32 %v1126_v58 }
 0x657   :  { %v1161_v56 = vrot.slane %v1160_v18, 2 }
 0x659   :  { %v1162_v4 = vadd.f32 %v1161_v56, %v1160_v18  ;;  %1476 = vmatmul.msk.f32.gmra.mxu3 %vm643_vm13, %v1196_v14 }
 0x65b   :  { %v1163_v36 = vrot.slane %v1162_v4, 1  ;;  %v1547_v6 = vpop.eup %1546 }
 0x65c   :  { %v1130_v25 = vmul.f32 %v1547_v6, %v1539_v27 }
 0x65d   :  { %v1164_v2 = vadd.f32 %v1163_v36, %v1162_v4 }
 0x65f   :  { %1548 = vrcp.f32 %v1164_v2 }
 0x661   :  { %1477 = vmatmul.msk.f32.gmra.mxu3 %vm643_vm13, %v1197_v51 }
 0x665   :  { %v1549_v16 = vpop.eup %1548 }
 0x666   :  { %v1168_v17 = vmul.f32 %v1549_v16, %v1545_v55 }
 0x668   :  { %1479 = vmatpush.msk.msra.mxu0 %vm97_vm1, %v1168_v17 }
 0x669   :  { %1478 = vmatmul.msk.f32.gmra.mxu3 %vm643_vm13, %v1198_v21 }
 0x66a   :  { %1267 = vmatpush.msra.mxu0 %v1130_v25 }
 0x66b   :  { %1480 = vmatmul.msk.f32.vlgmr.msra.gmra.mxu0 %vm643_vm13, %v1195_v43 }
 0x673   :  { %1481 = vmatmul.msk.f32.gmra.mxu0 %vm643_vm13, %v1196_v14 }
 0x67b   :  { %1482 = vmatmul.msk.f32.gmra.mxu0 %vm643_vm13, %v1197_v51 }
 0x683   :  { %1483 = vmatmul.msk.f32.gmra.mxu0 %vm643_vm13, %v1198_v21 }
 0x6d4   :  { %v1240_v22 = vpop.f32.mrf.mxu3 }
 0x6dc   :  { %v1243_v28 = vpop.f32.mrf.mxu3 }
 0x6e4   :  { %v1246_v38 = vpop.f32.mrf.mxu3 }
 0x6e8   :  { %v1269_v50 = vpop.f32.mrf.mxu0 }
 0x6ec   :  { %v1249_v15 = vpop.f32.mrf.mxu3 }
 0x6ed   :  { %1293 = vmatpush.msrb.mxu1 %v1249_v15 }
 0x6ef   :  { %1294 = vmatpush.msrb.mxu1 %v1246_v38 }
 0x6f0   :  { %v1272_v24 = vpop.f32.mrf.mxu0 }
 0x6f1   :  { %1295 = vmatpush.msrb.mxu1 %v1243_v28 }
 0x6f3   :  { %1296 = vmatpush.msrb.mxu1 %v1240_v22 }
 0x6f4   :  { %1484 = vmatmul.msk.f32.vlgmr.msrb.gmra.mxu1 %vm41_vm0, %v1832_v23 }
 0x6f8   :  { %v1275_v61 = vpop.f32.mrf.mxu0 }
 0x6fc   :  { %1485 = vmatmul.msk.f32.gmra.mxu1 %vm41_vm0, %v1839_v26 }
 0x700   :  { %v1278_v42 = vpop.f32.mrf.mxu0 }
 0x701   :  { %1322 = vmatpush.msrb.mxu2 %v1278_v42 }
 0x703   :  { %1323 = vmatpush.msrb.mxu2 %v1275_v61 }
 0x704   :  { %1486 = vmatmul.msk.f32.gmra.mxu1 %vm41_vm0, %v1847_v29 }
 0x705   :  { %1324 = vmatpush.msrb.mxu2 %v1272_v24 }
 0x707   :  { %1325 = vmatpush.msrb.mxu2 %v1269_v50 }
 0x708   :  { %1488 = vmatmul.msk.f32.vlgmr.msrb.gmra.mxu2 %vm41_vm0, %v1832_v23 }
 0x70c   :  { %1487 = vmatmul.msk.f32.gmra.mxu1 %vm41_vm0, %v1857_v62 }
 0x710   :  { %1489 = vmatmul.msk.f32.gmra.mxu2 %vm41_vm0, %v1839_v26 }
 0x718   :  { %1490 = vmatmul.msk.f32.gmra.mxu2 %vm41_vm0, %v1847_v29 }
 0x720   :  { %1491 = vmatmul.msk.f32.gmra.mxu2 %vm41_vm0, %v1857_v62 }
 0x771   :  { %v1298_v0 = vpop.f32.mrf.mxu1 }
 0x772   :  { %v1339_v26 = vadd.f32 %v1298_v0, %v1905_v9 }
 0x779   :  { %v1301_v30 = vpop.f32.mrf.mxu1 }
 0x77a   :  { %v1341_v31 = vadd.f32 %v1301_v30, %v1902_v5 }
 0x781   :  { %v1304_v59 = vpop.f32.mrf.mxu1 }
 0x782   :  { %v1343_v23 = vadd.f32 %v1304_v59, %v1899_v47 }
 0x789   :  { %v1307_v32 = vpop.f32.mrf.mxu1 }
 0x78a   :  { %v1345_v60 = vadd.f32 %v1307_v32, %v1894_v3 }
 0x78b   :  { %v1327_v33 = vpop.f32.mrf.mxu2 }
 0x78c   :  { %1359 = vmatpush.msrb.mxu3 %v1345_v60  ;;  %v1340_v5 = vadd.f32 %v1327_v33, %v1925_v13 }
 0x78e   :  { %1360 = vmatpush.msrb.mxu3 %v1343_v23 }
 0x790   :  { %1361 = vmatpush.msrb.mxu3 %v1341_v31 }
 0x792   :  { %1362 = vmatpush.msrb.mxu3 %v1339_v26 }
 0x793   :  { %v1330_v29 = vpop.f32.mrf.mxu2  ;;  %1492 = vmatmul.msk.f32.vlgmr.msrb.gmra.mxu3 %vm41_vm0, %v1883_v48 }
 0x794   :  { %v1342_v47 = vadd.f32 %v1330_v29, %v1922_v12 }
 0x79b   :  { %v1333_v62 = vpop.f32.mrf.mxu2 }
 0x79c   :  { %v1344_v3 = vadd.f32 %v1333_v62, %v1917_v10 }
 0x7a3   :  { %v1336_v34 = vpop.f32.mrf.mxu2 }
 0x7a4   :  { %v1346_v7 = vadd.f32 %v1336_v34, %v1914_v20 }
 0x7a6   :  { %1379 = vmatpush.msrb.mxu0 %v1346_v7 }
 0x7a8   :  { %1380 = vmatpush.msrb.mxu0 %v1344_v3 }
 0x7aa   :  { %1381 = vmatpush.msrb.mxu0 %v1342_v47 }
 0x7ac   :  { %1382 = vmatpush.msrb.mxu0 %v1340_v5 }
 0x7ad   :  { %1493 = vmatmul.msk.f32.vlgmr.msrb.gmra.mxu0 %vm41_vm0, %v1883_v48 }
 0x816   :  { %v1364_v35 = vpop.f32.mrf.mxu3 }
 0x817   :  { %v1365_v20 = vadd.f32 %v1364_v35, %v1945_v63 }
 0x82a   :  { %v1384_v9 = vpop.f32.mrf.mxu0 }
 0x82b   :  { %v1385_v40 = vadd.f32 %v1384_v9, %v1945_v63 }
 0x82d   :  { %v1389_v11 = vrot.slane %v1385_v40, 4 }
 0x82f   :  { %v1390_v10 = vsel %vm97_vm1, %v1365_v20, %v1389_v11 }
 0x830   :  { %1494 = vst [vmem:[%s2013_s5 + $0x8] sm:$0xff] %v1390_v10 }
 0x831   :  { %1398 = vsyncpa [#allocation3], 1 }

</bundles_post_ra>
